<compile_context>
chip_gen: v5e
topology: v5e:2x2
jax: 0.10.0
libtpu: 0.0.40
codegen_flags: <defaults>
</compile_context>

<pallas_src>
import functools

import jax
import jax.numpy as jnp
from jax import lax
from jax.experimental import pallas as pl
from jax.experimental.pallas import tpu as pltpu
import numpy as np

NEXTRA = 0              # nextrafields (pass-through not exercised here)
NFEAT = 5 + NEXTRA      # LoLa features per object
NCOMP = 4 + NEXTRA      # four-vector components per object
BN_EPS = 1e-5
LANE = 128              # vreg lane width
SUB = 8                 # vreg sublane count


def _round_up(x, m):
    return ((x + m - 1) // m) * m


def _full_spec(shape):
    nd = len(shape)
    return pl.BlockSpec(shape, lambda i, _nd=nd: (0,) * _nd)


# ---------------------------------------------------------------------------
# Fused kernel: extract+CoLa + LoLa + BatchNorm1d (batch stats) + FFN head
# ---------------------------------------------------------------------------
def fused_head_kernel(vec_ref, ext_ref, wdT_ref, weT_ref, wdrs_ref,
                      gamma_ref, beta_ref, w1_ref, b1_ref, w2_ref, b2_ref,
                      out_ref, *, inv_b):
    TP = wdT_ref.shape[0]          # 128: lane-padded object axis

    # Component extraction + CoLa fused into ONE MXU matmul.  `ext` packs the
    # four (4N -> T) per-component projections into 128-wide lane blocks, so
    # the E/px/py/pz splits below are aligned lane-tile views.
    proj = jnp.dot(vec_ref[...], ext_ref[...],
                   preferred_element_type=jnp.float32)          # (Bp, 4*TP)
    E = proj[:, 0 * TP:1 * TP]
    px = proj[:, 1 * TP:2 * TP]
    py = proj[:, 2 * TP:3 * TP]
    pz = proj[:, 3 * TP:4 * TP]

    m2 = E * E - px * px - py * py - pz * pz
    pt = jnp.sqrt(px * px + py * py)

    # Small matvecs as separate 128-padded MXU dots (MXU has huge slack; no
    # misaligned row/column slices anywhere).
    wdT = wdT_ref[...]
    m2_wd = jnp.dot(m2, wdT, preferred_element_type=jnp.float32)
    e_wd = jnp.dot(E, wdT, preferred_element_type=jnp.float32)
    px_wd = jnp.dot(px, wdT, preferred_element_type=jnp.float32)
    py_wd = jnp.dot(py, wdT, preferred_element_type=jnp.float32)
    pz_wd = jnp.dot(pz, wdT, preferred_element_type=jnp.float32)
    wE = jnp.dot(E, weT_ref[...], preferred_element_type=jnp.float32)

    # Minkowski-Gram identity: sum_j Wd[i,j] d2_ij without the (B,T,T) tensor.
    wd = (m2 * wdrs_ref[...] + m2_wd
          - 2.0 * (E * e_wd - px * px_wd - py * py_wd - pz * pz_wd))

    # LoLa feature block; concat offsets are multiples of 128 -> aligned.
    x = jnp.concatenate([m2, pt, E, wE, wd], axis=1)            # (Bp, 5*TP)

    # BatchNorm1d with training-mode (biased) batch statistics, single reduce
    # pass.  Zero pad rows contribute nothing; divide by the REAL batch size.
    s = jnp.sum(x, axis=0, keepdims=True)
    s2 = jnp.sum(x * x, axis=0, keepdims=True)
    mean = s * inv_b
    var = jnp.maximum(s2 * inv_b - mean * mean, 0.0)
    xn = (x - mean) * lax.rsqrt(var + BN_EPS) * gamma_ref[...] + beta_ref[...]

    # FeedForwardHead: Linear -> ReLU -> Linear -> Sigmoid (stable split form,
    # reciprocal on the otherwise-idle EUP slot).
    h = jnp.maximum(
        jnp.dot(xn, w1_ref[...], preferred_element_type=jnp.float32) + b1_ref[...],
        0.0)
    o = jnp.dot(h, w2_ref[...], preferred_element_type=jnp.float32) + b2_ref[...]
    e = jnp.exp(-jnp.abs(o))
    r = pl.reciprocal(1.0 + e, approx=True)
    out_ref[...] = jnp.where(o >= 0.0, r, 1.0 - r)


def fused_head(flat_pad, kp, b_real):
    args = (flat_pad, kp["ext_cola"], kp["wd_t"], kp["we_t"], kp["wd_rowsum"],
            kp["gamma"], kp["beta"], kp["w1"], kp["b1"], kp["w2"], kp["b2"])
    b_pad = flat_pad.shape[0]
    o_pad = kp["w2"].shape[1]
    return pl.pallas_call(
        functools.partial(fused_head_kernel, inv_b=1.0 / float(b_real)),
        out_shape=jax.ShapeDtypeStruct((b_pad, o_pad), jnp.float32),
        grid=(1,),
        in_specs=[_full_spec(a.shape) for a in args],
        out_specs=_full_spec((b_pad, o_pad)),
        compiler_params=pltpu.CompilerParams(dimension_semantics=("arbitrary",)),
    )(*args)


def head_forward(vec, kp):
    # vec: (B, N, 4+NEXTRA).  Flatten object-major (a view) and zero-pad the
    # batch to a sublane multiple so every (B, .) row-tile is full; BN divides
    # by the real batch size so the pad rows never bias statistics.
    B, N, C = vec.shape
    b_pad = max(_round_up(B, SUB), SUB)
    flat = vec.reshape(B, N * C)
    if b_pad != B:
        flat = jnp.pad(flat, ((0, b_pad - B), (0, 0)))
    out = fused_head(flat, kp, B)
    return out[:B, :kp["out_dim"]]


# ---------------------------------------------------------------------------
# Hydra forward (selection loop is plain-JAX glue between the two fused heads)
# ---------------------------------------------------------------------------
def select_survivors(isrtag, vectors, nkeep=6):
    # Replicates the Hydra loop: repeatedly drop the per-event argmin of isrtag
    # (and the matching vector) until nkeep objects remain; original order kept.
    B, N = isrtag.shape
    work = isrtag
    removed = jnp.zeros((B, N), dtype=jnp.int32)
    col = jnp.arange(N)[None, :]
    for _ in range(N - nkeep):
        mi = jnp.argmin(work, axis=1)
        hit = col == mi[:, None]
        removed = jnp.where(hit, 1, removed)
        work = jnp.where(hit, jnp.inf, work)
    order = jnp.argsort(removed, axis=1, stable=True)   # kept objects first
    keep = order[:, :nkeep]
    return jnp.take_along_axis(vectors, keep[:, :, None], axis=1)


def hydra_forward(flat_vectors, kparams, nobjects):
    B = flat_vectors.shape[0]
    vectors = flat_vectors.reshape(B, nobjects, NCOMP)
    out_isr = head_forward(vectors, kparams["isr"])            # (B, nobjects)
    selected = select_survivors(out_isr, vectors, 6)           # (B, 6, 4)
    out_decay = head_forward(selected, kparams["decay"])       # (B, 11)
    return jnp.concatenate([out_isr, out_decay], axis=1)


# ---------------------------------------------------------------------------
# Parameter init (synthetic, mirrors module __init__ shapes) + kernel-side prep
# ---------------------------------------------------------------------------
def init_head_params(key, nin_objects, ncombos, out_dim, hidden):
    T = nin_objects + ncombos
    F = T * NFEAT
    ks = jax.random.split(key, 6)
    w_combo = jax.random.normal(ks[0], (ncombos, nin_objects), jnp.float32)
    cola = jnp.concatenate([jnp.eye(nin_objects, dtype=jnp.float32), w_combo], axis=0)
    return dict(
        cola=cola,
        w_ener=jax.random.normal(ks[1], (T, T), jnp.float32),
        w_dist=jax.random.normal(ks[2], (T, T), jnp.float32),
        # randomised (instead of BatchNorm1d's default ones/zeros) to exercise
        # the feature-permutation path end-to-end in the correctness check
        gamma=1.0 + 0.1 * jax.random.normal(ks[3], (1, F), jnp.float32),
        beta=0.1 * jax.random.normal(ks[4], (1, F), jnp.float32),
        w1=jax.random.normal(ks[5], (F, hidden), jnp.float32) / jnp.sqrt(float(F)),
        b1=jnp.zeros((1, hidden), jnp.float32),
        w2=jax.random.normal(jax.random.fold_in(ks[5], 1), (hidden, out_dim),
                             jnp.float32) / jnp.sqrt(float(hidden)),
        b2=jnp.zeros((1, out_dim), jnp.float32),
    )


def prepare_head_params(p):
    """One-time host-side prep: fused extraction+CoLa matrix, 128-lane padded
    Wd^T / W_E^T / BN params / MLP weights, feature re-permutation."""
    cola = np.asarray(p["cola"], np.float32)                 # (T, N)
    T, N = cola.shape
    TP = LANE
    assert T <= TP
    w1 = np.asarray(p["w1"], np.float32)                     # (F, H)
    w2 = np.asarray(p["w2"], np.float32)                     # (H, O)
    H, O = w2.shape
    HP = _round_up(H, LANE)
    OP = _round_up(O, LANE)

    # Fused "pick component c of every object, then apply CoLa^T" matrix.
    ext = np.zeros((NCOMP * N, 4 * TP), np.float32)
    colaT = cola.T                                           # (N, T)
    for c in range(4):
        ext[np.arange(N) * NCOMP + c, c * TP:c * TP + T] = colaT

    wdist = np.asarray(p["w_dist"], np.float32)
    wener = np.asarray(p["w_ener"], np.float32)
    wd_t = np.zeros((TP, TP), np.float32); wd_t[:T, :T] = wdist.T
    we_t = np.zeros((TP, TP), np.float32); we_t[:T, :T] = wener.T
    wdrs = np.zeros((1, TP), np.float32); wdrs[0, :T] = wdist.sum(axis=1)

    # Feature layout: kernel block f occupies lanes [f*128, f*128+T) and maps to
    # the original (object-major) feature index t*NFEAT + f.
    gamma = np.asarray(p["gamma"], np.float32).reshape(-1)
    beta = np.asarray(p["beta"], np.float32).reshape(-1)
    gcat = np.zeros((1, NFEAT * TP), np.float32)
    bcat = np.zeros((1, NFEAT * TP), np.float32)
    w1p = np.zeros((NFEAT * TP, HP), np.float32)
    for f in range(NFEAT):
        gcat[0, f * TP:f * TP + T] = gamma[f::NFEAT]
        bcat[0, f * TP:f * TP + T] = beta[f::NFEAT]
        w1p[f * TP:f * TP + T, :H] = w1[f::NFEAT, :]

    b1p = np.zeros((1, HP), np.float32); b1p[0, :H] = np.asarray(p["b1"]).reshape(-1)
    w2p = np.zeros((HP, OP), np.float32); w2p[:H, :O] = w2
    b2p = np.zeros((1, OP), np.float32); b2p[0, :O] = np.asarray(p["b2"]).reshape(-1)

    return dict(
        ext_cola=jnp.asarray(ext),
        wd_t=jnp.asarray(wd_t),
        we_t=jnp.asarray(we_t),
        wd_rowsum=jnp.asarray(wdrs),
        gamma=jnp.asarray(gcat),
        beta=jnp.asarray(bcat),
        w1=jnp.asarray(w1p),
        b1=jnp.asarray(b1p),
        w2=jnp.asarray(w2p),
        b2=jnp.asarray(b2p),
        out_dim=int(O),
    )


# ---------------------------------------------------------------------------
# Pure-JAX reference (original pairwise / object-major formulation)
# ---------------------------------------------------------------------------
def _ref_head(vec, p):
    combined = jnp.einsum("ij,bjk->bik", p["cola"], vec)
    E, px, py, pz = (combined[..., c] for c in range(4))
    m2 = E * E - px * px - py * py - pz * pz
    pt = jnp.sqrt(px * px + py * py)
    wE = jnp.einsum("ij,bj->bi", p["w_ener"], E)
    d = combined[:, :, None, :4] - combined[:, None, :, :4]
    d2 = d[..., 0] ** 2 - d[..., 1] ** 2 - d[..., 2] ** 2 - d[..., 3] ** 2
    wd = jnp.einsum("ij,bij->bi", p["w_dist"], d2)
    x = jnp.stack([m2, pt, E, wE, wd], axis=-1).reshape(vec.shape[0], -1)
    mean = jnp.mean(x, axis=0, keepdims=True)
    var = jnp.mean((x - mean) ** 2, axis=0, keepdims=True)
    xn = (x - mean) * lax.rsqrt(var + BN_EPS) * p["gamma"] + p["beta"]
    h = jnp.maximum(xn @ p["w1"] + p["b1"], 0.0)
    o = h @ p["w2"] + p["b2"]
    return jax.nn.sigmoid(o)


def hydra_ref(flat_vectors, raw_params, nobjects):
    B = flat_vectors.shape[0]
    vectors = flat_vectors.reshape(B, nobjects, NCOMP)
    out_isr = _ref_head(vectors, raw_params["isr"])
    selected = select_survivors(out_isr, vectors, 6)
    out_decay = _ref_head(selected, raw_params["decay"])
    return jnp.concatenate([out_isr, out_decay], axis=1)


if __name__ == "__main__":
    nobjects, ncombos, hidden, B = 8, 3, 32, 4
    key = jax.random.PRNGKey(0)
    kx, kisr, kdec = jax.random.split(key, 3)
    raw_params = {
        "isr": init_head_params(kisr, nobjects, ncombos, nobjects, hidden),
        "decay": init_head_params(kdec, 6, ncombos, 11, hidden),
    }
    kparams = {k: prepare_head_params(v) for k, v in raw_params.items()}
    x = jax.random.normal(kx, (B, nobjects * NCOMP), jnp.float32)

    out = jax.jit(lambda v: hydra_forward(v, kparams, nobjects))(x)
    out = jax.block_until_ready(out)

    ref = hydra_ref(x, raw_params, nobjects)
    assert out.shape == (B, nobjects + 11)
    np.testing.assert_allclose(np.asarray(out), np.asarray(ref), rtol=3e-3, atol=3e-3)
    print("KERNEL_OK")
</pallas_src>

<mosaic_0001>
module attributes {stable_mosaic.version = 11 : i64} {
  func.func @fused_head_kernel(%arg0: i32, %arg1: memref<8x32xf32, #tpu.memory_space<vmem>>, %arg2: memref<32x512xf32, #tpu.memory_space<vmem>>, %arg3: memref<128x128xf32, #tpu.memory_space<vmem>>, %arg4: memref<128x128xf32, #tpu.memory_space<vmem>>, %arg5: memref<1x128xf32, #tpu.memory_space<vmem>>, %arg6: memref<1x640xf32, #tpu.memory_space<vmem>>, %arg7: memref<1x640xf32, #tpu.memory_space<vmem>>, %arg8: memref<640x128xf32, #tpu.memory_space<vmem>>, %arg9: memref<1x128xf32, #tpu.memory_space<vmem>>, %arg10: memref<128x128xf32, #tpu.memory_space<vmem>>, %arg11: memref<1x128xf32, #tpu.memory_space<vmem>>, %arg12: memref<8x128xf32, #tpu.memory_space<vmem>>) attributes {dimension_semantics = [#tpu.dimension_semantics<arbitrary>], iteration_bounds = array<i64: 1>, scalar_prefetch = 0 : i64, scratch_operands = 0 : i64, tpu.core_type = #tpu.core_type<tc>, window_params = [{pipeline_mode = #tpu.pipeline_mode<synchronous>, transform_indices = @transform_0, window_bounds = array<i64: 8, 32>}, {pipeline_mode = #tpu.pipeline_mode<synchronous>, transform_indices = @transform_1, window_bounds = array<i64: 32, 512>}, {pipeline_mode = #tpu.pipeline_mode<synchronous>, transform_indices = @transform_2, window_bounds = array<i64: 128, 128>}, {pipeline_mode = #tpu.pipeline_mode<synchronous>, transform_indices = @transform_3, window_bounds = array<i64: 128, 128>}, {pipeline_mode = #tpu.pipeline_mode<synchronous>, transform_indices = @transform_4, window_bounds = array<i64: 1, 128>}, {pipeline_mode = #tpu.pipeline_mode<synchronous>, transform_indices = @transform_5, window_bounds = array<i64: 1, 640>}, {pipeline_mode = #tpu.pipeline_mode<synchronous>, transform_indices = @transform_6, window_bounds = array<i64: 1, 640>}, {pipeline_mode = #tpu.pipeline_mode<synchronous>, transform_indices = @transform_7, window_bounds = array<i64: 640, 128>}, {pipeline_mode = #tpu.pipeline_mode<synchronous>, transform_indices = @transform_8, window_bounds = array<i64: 1, 128>}, {pipeline_mode = #tpu.pipeline_mode<synchronous>, transform_indices = @transform_9, window_bounds = array<i64: 128, 128>}, {pipeline_mode = #tpu.pipeline_mode<synchronous>, transform_indices = @transform_10, window_bounds = array<i64: 1, 128>}, {pipeline_mode = #tpu.pipeline_mode<synchronous>, transform_indices = @transform_11, window_bounds = array<i64: 8, 128>}]} {
    %c0 = arith.constant 0 : index
    %c0_0 = arith.constant 0 : index
    %0 = vector.load %arg1[%c0, %c0_0] : memref<8x32xf32, #tpu.memory_space<vmem>>, vector<8x32xf32>
    %c0_1 = arith.constant 0 : index
    %c0_2 = arith.constant 0 : index
    %1 = vector.load %arg2[%c0_1, %c0_2] : memref<32x512xf32, #tpu.memory_space<vmem>>, vector<32x512xf32>
    %cst = arith.constant dense<0.000000e+00> : vector<8x512xf32>
    %2 = tpu.matmul %0, %1, %cst {dimension_numbers = #tpu.dot_dimension_numbers<[1], [0], [0], [1], [0, 0, 1, 1], [], []>} : vector<8x32xf32>, vector<32x512xf32>, vector<8x512xf32> -> vector<8x512xf32>
    %3 = vector.extract_strided_slice %2 {offsets = [0, 0], sizes = [8, 128], strides = [1, 1]} : vector<8x512xf32> to vector<8x128xf32>
    %4 = vector.extract_strided_slice %2 {offsets = [0, 128], sizes = [8, 128], strides = [1, 1]} : vector<8x512xf32> to vector<8x128xf32>
    %5 = vector.extract_strided_slice %2 {offsets = [0, 256], sizes = [8, 128], strides = [1, 1]} : vector<8x512xf32> to vector<8x128xf32>
    %6 = vector.extract_strided_slice %2 {offsets = [0, 384], sizes = [8, 128], strides = [1, 1]} : vector<8x512xf32> to vector<8x128xf32>
    %7 = arith.mulf %3, %3 : vector<8x128xf32>
    %8 = arith.mulf %4, %4 : vector<8x128xf32>
    %9 = arith.subf %7, %8 : vector<8x128xf32>
    %10 = arith.mulf %5, %5 : vector<8x128xf32>
    %11 = arith.subf %9, %10 : vector<8x128xf32>
    %12 = arith.mulf %6, %6 : vector<8x128xf32>
    %13 = arith.subf %11, %12 : vector<8x128xf32>
    %14 = arith.mulf %4, %4 : vector<8x128xf32>
    %15 = arith.mulf %5, %5 : vector<8x128xf32>
    %16 = arith.addf %14, %15 : vector<8x128xf32>
    %17 = math.sqrt %16 : vector<8x128xf32>
    %c0_3 = arith.constant 0 : index
    %c0_4 = arith.constant 0 : index
    %18 = vector.load %arg3[%c0_3, %c0_4] : memref<128x128xf32, #tpu.memory_space<vmem>>, vector<128x128xf32>
    %cst_5 = arith.constant dense<0.000000e+00> : vector<8x128xf32>
    %19 = tpu.matmul %13, %18, %cst_5 {dimension_numbers = #tpu.dot_dimension_numbers<[1], [0], [0], [1], [0, 0, 1, 1], [], []>} : vector<8x128xf32>, vector<128x128xf32>, vector<8x128xf32> -> vector<8x128xf32>
    %cst_6 = arith.constant dense<0.000000e+00> : vector<8x128xf32>
    %20 = tpu.matmul %3, %18, %cst_6 {dimension_numbers = #tpu.dot_dimension_numbers<[1], [0], [0], [1], [0, 0, 1, 1], [], []>} : vector<8x128xf32>, vector<128x128xf32>, vector<8x128xf32> -> vector<8x128xf32>
    %cst_7 = arith.constant dense<0.000000e+00> : vector<8x128xf32>
    %21 = tpu.matmul %4, %18, %cst_7 {dimension_numbers = #tpu.dot_dimension_numbers<[1], [0], [0], [1], [0, 0, 1, 1], [], []>} : vector<8x128xf32>, vector<128x128xf32>, vector<8x128xf32> -> vector<8x128xf32>
    %cst_8 = arith.constant dense<0.000000e+00> : vector<8x128xf32>
    %22 = tpu.matmul %5, %18, %cst_8 {dimension_numbers = #tpu.dot_dimension_numbers<[1], [0], [0], [1], [0, 0, 1, 1], [], []>} : vector<8x128xf32>, vector<128x128xf32>, vector<8x128xf32> -> vector<8x128xf32>
    %cst_9 = arith.constant dense<0.000000e+00> : vector<8x128xf32>
    %23 = tpu.matmul %6, %18, %cst_9 {dimension_numbers = #tpu.dot_dimension_numbers<[1], [0], [0], [1], [0, 0, 1, 1], [], []>} : vector<8x128xf32>, vector<128x128xf32>, vector<8x128xf32> -> vector<8x128xf32>
    %c0_10 = arith.constant 0 : index
    %c0_11 = arith.constant 0 : index
    %24 = vector.load %arg4[%c0_10, %c0_11] : memref<128x128xf32, #tpu.memory_space<vmem>>, vector<128x128xf32>
    %cst_12 = arith.constant dense<0.000000e+00> : vector<8x128xf32>
    %25 = tpu.matmul %3, %24, %cst_12 {dimension_numbers = #tpu.dot_dimension_numbers<[1], [0], [0], [1], [0, 0, 1, 1], [], []>} : vector<8x128xf32>, vector<128x128xf32>, vector<8x128xf32> -> vector<8x128xf32>
    %c0_13 = arith.constant 0 : index
    %c0_14 = arith.constant 0 : index
    %26 = vector.load %arg5[%c0_13, %c0_14] : memref<1x128xf32, #tpu.memory_space<vmem>>, vector<1x128xf32>
    %27 = vector.broadcast %26 : vector<1x128xf32> to vector<8x128xf32>
    %28 = arith.mulf %13, %27 : vector<8x128xf32>
    %29 = arith.addf %28, %19 : vector<8x128xf32>
    %30 = arith.mulf %3, %20 : vector<8x128xf32>
    %31 = arith.mulf %4, %21 : vector<8x128xf32>
    %32 = arith.subf %30, %31 : vector<8x128xf32>
    %33 = arith.mulf %5, %22 : vector<8x128xf32>
    %34 = arith.subf %32, %33 : vector<8x128xf32>
    %35 = arith.mulf %6, %23 : vector<8x128xf32>
    %36 = arith.subf %34, %35 : vector<8x128xf32>
    %cst_15 = arith.constant 2.000000e+00 : f32
    %37 = vector.broadcast %cst_15 : f32 to vector<8x128xf32>
    %38 = arith.mulf %37, %36 : vector<8x128xf32>
    %39 = arith.subf %29, %38 : vector<8x128xf32>
    %40 = tpu.concatenate %13, %17, %3, %25, %39 in 1 : vector<8x128xf32>, vector<8x128xf32>, vector<8x128xf32>, vector<8x128xf32>, vector<8x128xf32> -> vector<8x640xf32>
    %cst_16 = arith.constant dense<0.000000e+00> : vector<640xf32>
    %41 = vector.multi_reduction <add>, %40, %cst_16 [0] : vector<8x640xf32> to vector<640xf32>
    %42 = vector.shape_cast %41 : vector<640xf32> to vector<1x640xf32>
    %43 = arith.mulf %40, %40 : vector<8x640xf32>
    %cst_17 = arith.constant dense<0.000000e+00> : vector<640xf32>
    %44 = vector.multi_reduction <add>, %43, %cst_17 [0] : vector<8x640xf32> to vector<640xf32>
    %45 = vector.shape_cast %44 : vector<640xf32> to vector<1x640xf32>
    %cst_18 = arith.constant 2.500000e-01 : f32
    %46 = vector.broadcast %cst_18 : f32 to vector<1x640xf32>
    %47 = arith.mulf %42, %46 : vector<1x640xf32>
    %cst_19 = arith.constant 2.500000e-01 : f32
    %48 = vector.broadcast %cst_19 : f32 to vector<1x640xf32>
    %49 = arith.mulf %45, %48 : vector<1x640xf32>
    %50 = arith.mulf %47, %47 : vector<1x640xf32>
    %51 = arith.subf %49, %50 : vector<1x640xf32>
    %cst_20 = arith.constant 0.000000e+00 : f32
    %52 = vector.broadcast %cst_20 : f32 to vector<1x640xf32>
    %53 = arith.maximumf %51, %52 : vector<1x640xf32>
    %54 = vector.broadcast %47 : vector<1x640xf32> to vector<8x640xf32>
    %55 = arith.subf %40, %54 : vector<8x640xf32>
    %cst_21 = arith.constant 9.99999974E-6 : f32
    %56 = vector.broadcast %cst_21 : f32 to vector<1x640xf32>
    %57 = arith.addf %53, %56 : vector<1x640xf32>
    %58 = math.rsqrt %57 : vector<1x640xf32>
    %59 = vector.broadcast %58 : vector<1x640xf32> to vector<8x640xf32>
    %60 = arith.mulf %55, %59 : vector<8x640xf32>
    %c0_22 = arith.constant 0 : index
    %c0_23 = arith.constant 0 : index
    %61 = vector.load %arg6[%c0_22, %c0_23] : memref<1x640xf32, #tpu.memory_space<vmem>>, vector<1x640xf32>
    %62 = vector.broadcast %61 : vector<1x640xf32> to vector<8x640xf32>
    %63 = arith.mulf %60, %62 : vector<8x640xf32>
    %c0_24 = arith.constant 0 : index
    %c0_25 = arith.constant 0 : index
    %64 = vector.load %arg7[%c0_24, %c0_25] : memref<1x640xf32, #tpu.memory_space<vmem>>, vector<1x640xf32>
    %65 = vector.broadcast %64 : vector<1x640xf32> to vector<8x640xf32>
    %66 = arith.addf %63, %65 : vector<8x640xf32>
    %c0_26 = arith.constant 0 : index
    %c0_27 = arith.constant 0 : index
    %67 = vector.load %arg8[%c0_26, %c0_27] : memref<640x128xf32, #tpu.memory_space<vmem>>, vector<640x128xf32>
    %cst_28 = arith.constant dense<0.000000e+00> : vector<8x128xf32>
    %68 = tpu.matmul %66, %67, %cst_28 {dimension_numbers = #tpu.dot_dimension_numbers<[1], [0], [0], [1], [0, 0, 1, 1], [], []>} : vector<8x640xf32>, vector<640x128xf32>, vector<8x128xf32> -> vector<8x128xf32>
    %c0_29 = arith.constant 0 : index
    %c0_30 = arith.constant 0 : index
    %69 = vector.load %arg9[%c0_29, %c0_30] : memref<1x128xf32, #tpu.memory_space<vmem>>, vector<1x128xf32>
    %70 = vector.broadcast %69 : vector<1x128xf32> to vector<8x128xf32>
    %71 = arith.addf %68, %70 : vector<8x128xf32>
    %cst_31 = arith.constant 0.000000e+00 : f32
    %72 = vector.broadcast %cst_31 : f32 to vector<8x128xf32>
    %73 = arith.maximumf %71, %72 : vector<8x128xf32>
    %c0_32 = arith.constant 0 : index
    %c0_33 = arith.constant 0 : index
    %74 = vector.load %arg10[%c0_32, %c0_33] : memref<128x128xf32, #tpu.memory_space<vmem>>, vector<128x128xf32>
    %cst_34 = arith.constant dense<0.000000e+00> : vector<8x128xf32>
    %75 = tpu.matmul %73, %74, %cst_34 {dimension_numbers = #tpu.dot_dimension_numbers<[1], [0], [0], [1], [0, 0, 1, 1], [], []>} : vector<8x128xf32>, vector<128x128xf32>, vector<8x128xf32> -> vector<8x128xf32>
    %c0_35 = arith.constant 0 : index
    %c0_36 = arith.constant 0 : index
    %76 = vector.load %arg11[%c0_35, %c0_36] : memref<1x128xf32, #tpu.memory_space<vmem>>, vector<1x128xf32>
    %77 = vector.broadcast %76 : vector<1x128xf32> to vector<8x128xf32>
    %78 = arith.addf %75, %77 : vector<8x128xf32>
    %79 = math.absf %78 : vector<8x128xf32>
    %cst_37 = arith.constant 0.000000e+00 : f32
    %80 = vector.broadcast %cst_37 : f32 to vector<8x128xf32>
    %81 = arith.subf %80, %79 : vector<8x128xf32>
    %82 = math.exp %81 : vector<8x128xf32>
    %cst_38 = arith.constant 1.000000e+00 : f32
    %83 = vector.broadcast %cst_38 : f32 to vector<8x128xf32>
    %84 = arith.addf %83, %82 : vector<8x128xf32>
    %85 = tpu.reciprocal %84 {approx = true} : vector<8x128xf32> -> vector<8x128xf32>
    %cst_39 = arith.constant 0.000000e+00 : f32
    %86 = vector.broadcast %cst_39 : f32 to vector<8x128xf32>
    %87 = arith.cmpf oge, %78, %86 : vector<8x128xf32>
    %cst_40 = arith.constant 1.000000e+00 : f32
    %88 = vector.broadcast %cst_40 : f32 to vector<8x128xf32>
    %89 = arith.subf %88, %85 : vector<8x128xf32>
    %90 = arith.select %87, %85, %89 : vector<8x128xi1>, vector<8x128xf32>
    %c0_41 = arith.constant 0 : index
    %c0_42 = arith.constant 0 : index
    %91 = vector.load %arg12[%c0_41, %c0_42] : memref<8x128xf32, #tpu.memory_space<vmem>>, vector<8x128xf32>
    tpu.vector_store %arg12[%c0_41, %c0_42], %90 {strides = array<i32>} : memref<8x128xf32, #tpu.memory_space<vmem>>, vector<8x128xf32>,
    return
  }
  func.func @transform_0(%arg0: i32) -> (i32, i32) {
    %c0_i32 = arith.constant 0 : i32
    %c0_i32_0 = arith.constant 0 : i32
    %c0_i32_1 = arith.constant 0 : i32
    return %c0_i32, %c0_i32_0 : i32, i32
  }
  func.func @transform_1(%arg0: i32) -> (i32, i32) {
    %c0_i32 = arith.constant 0 : i32
    %c0_i32_0 = arith.constant 0 : i32
    %c0_i32_1 = arith.constant 0 : i32
    return %c0_i32, %c0_i32_0 : i32, i32
  }
  func.func @transform_2(%arg0: i32) -> (i32, i32) {
    %c0_i32 = arith.constant 0 : i32
    %c0_i32_0 = arith.constant 0 : i32
    %c0_i32_1 = arith.constant 0 : i32
    return %c0_i32, %c0_i32_0 : i32, i32
  }
  func.func @transform_3(%arg0: i32) -> (i32, i32) {
    %c0_i32 = arith.constant 0 : i32
    %c0_i32_0 = arith.constant 0 : i32
    %c0_i32_1 = arith.constant 0 : i32
    return %c0_i32, %c0_i32_0 : i32, i32
  }
  func.func @transform_4(%arg0: i32) -> (i32, i32) {
    %c0_i32 = arith.constant 0 : i32
    %c0_i32_0 = arith.constant 0 : i32
    %c0_i32_1 = arith.constant 0 : i32
    return %c0_i32, %c0_i32_0 : i32, i32
  }
  func.func @transform_5(%arg0: i32) -> (i32, i32) {
    %c0_i32 = arith.constant 0 : i32
    %c0_i32_0 = arith.constant 0 : i32
    %c0_i32_1 = arith.constant 0 : i32
    return %c0_i32, %c0_i32_0 : i32, i32
  }
  func.func @transform_6(%arg0: i32) -> (i32, i32) {
    %c0_i32 = arith.constant 0 : i32
    %c0_i32_0 = arith.constant 0 : i32
    %c0_i32_1 = arith.constant 0 : i32
    return %c0_i32, %c0_i32_0 : i32, i32
  }
  func.func @transform_7(%arg0: i32) -> (i32, i32) {
    %c0_i32 = arith.constant 0 : i32
    %c0_i32_0 = arith.constant 0 : i32
    %c0_i32_1 = arith.constant 0 : i32
    return %c0_i32, %c0_i32_0 : i32, i32
  }
  func.func @transform_8(%arg0: i32) -> (i32, i32) {
    %c0_i32 = arith.constant 0 : i32
    %c0_i32_0 = arith.constant 0 : i32
    %c0_i32_1 = arith.constant 0 : i32
    return %c0_i32, %c0_i32_0 : i32, i32
  }
  func.func @transform_9(%arg0: i32) -> (i32, i32) {
    %c0_i32 = arith.constant 0 : i32
    %c0_i32_0 = arith.constant 0 : i32
    %c0_i32_1 = arith.constant 0 : i32
    return %c0_i32, %c0_i32_0 : i32, i32
  }
  func.func @transform_10(%arg0: i32) -> (i32, i32) {
    %c0_i32 = arith.constant 0 : i32
    %c0_i32_0 = arith.constant 0 : i32
    %c0_i32_1 = arith.constant 0 : i32
    return %c0_i32, %c0_i32_0 : i32, i32
  }
  func.func @transform_11(%arg0: i32) -> (i32, i32) {
    %c0_i32 = arith.constant 0 : i32
    %c0_i32_0 = arith.constant 0 : i32
    %c0_i32_1 = arith.constant 0 : i32
    return %c0_i32, %c0_i32_0 : i32, i32
  }
}

module attributes {stable_mosaic.version = 11 : i64} {
  func.func @fused_head_kernel(%arg0: i32, %arg1: memref<8x24xf32, #tpu.memory_space<vmem>>, %arg2: memref<24x512xf32, #tpu.memory_space<vmem>>, %arg3: memref<128x128xf32, #tpu.memory_space<vmem>>, %arg4: memref<128x128xf32, #tpu.memory_space<vmem>>, %arg5: memref<1x128xf32, #tpu.memory_space<vmem>>, %arg6: memref<1x640xf32, #tpu.memory_space<vmem>>, %arg7: memref<1x640xf32, #tpu.memory_space<vmem>>, %arg8: memref<640x128xf32, #tpu.memory_space<vmem>>, %arg9: memref<1x128xf32, #tpu.memory_space<vmem>>, %arg10: memref<128x128xf32, #tpu.memory_space<vmem>>, %arg11: memref<1x128xf32, #tpu.memory_space<vmem>>, %arg12: memref<8x128xf32, #tpu.memory_space<vmem>>) attributes {dimension_semantics = [#tpu.dimension_semantics<arbitrary>], iteration_bounds = array<i64: 1>, scalar_prefetch = 0 : i64, scratch_operands = 0 : i64, tpu.core_type = #tpu.core_type<tc>, window_params = [{pipeline_mode = #tpu.pipeline_mode<synchronous>, transform_indices = @transform_0, window_bounds = array<i64: 8, 24>}, {pipeline_mode = #tpu.pipeline_mode<synchronous>, transform_indices = @transform_1, window_bounds = array<i64: 24, 512>}, {pipeline_mode = #tpu.pipeline_mode<synchronous>, transform_indices = @transform_2, window_bounds = array<i64: 128, 128>}, {pipeline_mode = #tpu.pipeline_mode<synchronous>, transform_indices = @transform_3, window_bounds = array<i64: 128, 128>}, {pipeline_mode = #tpu.pipeline_mode<synchronous>, transform_indices = @transform_4, window_bounds = array<i64: 1, 128>}, {pipeline_mode = #tpu.pipeline_mode<synchronous>, transform_indices = @transform_5, window_bounds = array<i64: 1, 640>}, {pipeline_mode = #tpu.pipeline_mode<synchronous>, transform_indices = @transform_6, window_bounds = array<i64: 1, 640>}, {pipeline_mode = #tpu.pipeline_mode<synchronous>, transform_indices = @transform_7, window_bounds = array<i64: 640, 128>}, {pipeline_mode = #tpu.pipeline_mode<synchronous>, transform_indices = @transform_8, window_bounds = array<i64: 1, 128>}, {pipeline_mode = #tpu.pipeline_mode<synchronous>, transform_indices = @transform_9, window_bounds = array<i64: 128, 128>}, {pipeline_mode = #tpu.pipeline_mode<synchronous>, transform_indices = @transform_10, window_bounds = array<i64: 1, 128>}, {pipeline_mode = #tpu.pipeline_mode<synchronous>, transform_indices = @transform_11, window_bounds = array<i64: 8, 128>}]} {
    %c0 = arith.constant 0 : index
    %c0_0 = arith.constant 0 : index
    %0 = vector.load %arg1[%c0, %c0_0] : memref<8x24xf32, #tpu.memory_space<vmem>>, vector<8x24xf32>
    %c0_1 = arith.constant 0 : index
    %c0_2 = arith.constant 0 : index
    %1 = vector.load %arg2[%c0_1, %c0_2] : memref<24x512xf32, #tpu.memory_space<vmem>>, vector<24x512xf32>
    %cst = arith.constant dense<0.000000e+00> : vector<8x512xf32>
    %2 = tpu.matmul %0, %1, %cst {dimension_numbers = #tpu.dot_dimension_numbers<[1], [0], [0], [1], [0, 0, 1, 1], [], []>} : vector<8x24xf32>, vector<24x512xf32>, vector<8x512xf32> -> vector<8x512xf32>
    %3 = vector.extract_strided_slice %2 {offsets = [0, 0], sizes = [8, 128], strides = [1, 1]} : vector<8x512xf32> to vector<8x128xf32>
    %4 = vector.extract_strided_slice %2 {offsets = [0, 128], sizes = [8, 128], strides = [1, 1]} : vector<8x512xf32> to vector<8x128xf32>
    %5 = vector.extract_strided_slice %2 {offsets = [0, 256], sizes = [8, 128], strides = [1, 1]} : vector<8x512xf32> to vector<8x128xf32>
    %6 = vector.extract_strided_slice %2 {offsets = [0, 384], sizes = [8, 128], strides = [1, 1]} : vector<8x512xf32> to vector<8x128xf32>
    %7 = arith.mulf %3, %3 : vector<8x128xf32>
    %8 = arith.mulf %4, %4 : vector<8x128xf32>
    %9 = arith.subf %7, %8 : vector<8x128xf32>
    %10 = arith.mulf %5, %5 : vector<8x128xf32>
    %11 = arith.subf %9, %10 : vector<8x128xf32>
    %12 = arith.mulf %6, %6 : vector<8x128xf32>
    %13 = arith.subf %11, %12 : vector<8x128xf32>
    %14 = arith.mulf %4, %4 : vector<8x128xf32>
    %15 = arith.mulf %5, %5 : vector<8x128xf32>
    %16 = arith.addf %14, %15 : vector<8x128xf32>
    %17 = math.sqrt %16 : vector<8x128xf32>
    %c0_3 = arith.constant 0 : index
    %c0_4 = arith.constant 0 : index
    %18 = vector.load %arg3[%c0_3, %c0_4] : memref<128x128xf32, #tpu.memory_space<vmem>>, vector<128x128xf32>
    %cst_5 = arith.constant dense<0.000000e+00> : vector<8x128xf32>
    %19 = tpu.matmul %13, %18, %cst_5 {dimension_numbers = #tpu.dot_dimension_numbers<[1], [0], [0], [1], [0, 0, 1, 1], [], []>} : vector<8x128xf32>, vector<128x128xf32>, vector<8x128xf32> -> vector<8x128xf32>
    %cst_6 = arith.constant dense<0.000000e+00> : vector<8x128xf32>
    %20 = tpu.matmul %3, %18, %cst_6 {dimension_numbers = #tpu.dot_dimension_numbers<[1], [0], [0], [1], [0, 0, 1, 1], [], []>} : vector<8x128xf32>, vector<128x128xf32>, vector<8x128xf32> -> vector<8x128xf32>
    %cst_7 = arith.constant dense<0.000000e+00> : vector<8x128xf32>
    %21 = tpu.matmul %4, %18, %cst_7 {dimension_numbers = #tpu.dot_dimension_numbers<[1], [0], [0], [1], [0, 0, 1, 1], [], []>} : vector<8x128xf32>, vector<128x128xf32>, vector<8x128xf32> -> vector<8x128xf32>
    %cst_8 = arith.constant dense<0.000000e+00> : vector<8x128xf32>
    %22 = tpu.matmul %5, %18, %cst_8 {dimension_numbers = #tpu.dot_dimension_numbers<[1], [0], [0], [1], [0, 0, 1, 1], [], []>} : vector<8x128xf32>, vector<128x128xf32>, vector<8x128xf32> -> vector<8x128xf32>
    %cst_9 = arith.constant dense<0.000000e+00> : vector<8x128xf32>
    %23 = tpu.matmul %6, %18, %cst_9 {dimension_numbers = #tpu.dot_dimension_numbers<[1], [0], [0], [1], [0, 0, 1, 1], [], []>} : vector<8x128xf32>, vector<128x128xf32>, vector<8x128xf32> -> vector<8x128xf32>
    %c0_10 = arith.constant 0 : index
    %c0_11 = arith.constant 0 : index
    %24 = vector.load %arg4[%c0_10, %c0_11] : memref<128x128xf32, #tpu.memory_space<vmem>>, vector<128x128xf32>
    %cst_12 = arith.constant dense<0.000000e+00> : vector<8x128xf32>
    %25 = tpu.matmul %3, %24, %cst_12 {dimension_numbers = #tpu.dot_dimension_numbers<[1], [0], [0], [1], [0, 0, 1, 1], [], []>} : vector<8x128xf32>, vector<128x128xf32>, vector<8x128xf32> -> vector<8x128xf32>
    %c0_13 = arith.constant 0 : index
    %c0_14 = arith.constant 0 : index
    %26 = vector.load %arg5[%c0_13, %c0_14] : memref<1x128xf32, #tpu.memory_space<vmem>>, vector<1x128xf32>
    %27 = vector.broadcast %26 : vector<1x128xf32> to vector<8x128xf32>
    %28 = arith.mulf %13, %27 : vector<8x128xf32>
    %29 = arith.addf %28, %19 : vector<8x128xf32>
    %30 = arith.mulf %3, %20 : vector<8x128xf32>
    %31 = arith.mulf %4, %21 : vector<8x128xf32>
    %32 = arith.subf %30, %31 : vector<8x128xf32>
    %33 = arith.mulf %5, %22 : vector<8x128xf32>
    %34 = arith.subf %32, %33 : vector<8x128xf32>
    %35 = arith.mulf %6, %23 : vector<8x128xf32>
    %36 = arith.subf %34, %35 : vector<8x128xf32>
    %cst_15 = arith.constant 2.000000e+00 : f32
    %37 = vector.broadcast %cst_15 : f32 to vector<8x128xf32>
    %38 = arith.mulf %37, %36 : vector<8x128xf32>
    %39 = arith.subf %29, %38 : vector<8x128xf32>
    %40 = tpu.concatenate %13, %17, %3, %25, %39 in 1 : vector<8x128xf32>, vector<8x128xf32>, vector<8x128xf32>, vector<8x128xf32>, vector<8x128xf32> -> vector<8x640xf32>
    %cst_16 = arith.constant dense<0.000000e+00> : vector<640xf32>
    %41 = vector.multi_reduction <add>, %40, %cst_16 [0] : vector<8x640xf32> to vector<640xf32>
    %42 = vector.shape_cast %41 : vector<640xf32> to vector<1x640xf32>
    %43 = arith.mulf %40, %40 : vector<8x640xf32>
    %cst_17 = arith.constant dense<0.000000e+00> : vector<640xf32>
    %44 = vector.multi_reduction <add>, %43, %cst_17 [0] : vector<8x640xf32> to vector<640xf32>
    %45 = vector.shape_cast %44 : vector<640xf32> to vector<1x640xf32>
    %cst_18 = arith.constant 2.500000e-01 : f32
    %46 = vector.broadcast %cst_18 : f32 to vector<1x640xf32>
    %47 = arith.mulf %42, %46 : vector<1x640xf32>
    %cst_19 = arith.constant 2.500000e-01 : f32
    %48 = vector.broadcast %cst_19 : f32 to vector<1x640xf32>
    %49 = arith.mulf %45, %48 : vector<1x640xf32>
    %50 = arith.mulf %47, %47 : vector<1x640xf32>
    %51 = arith.subf %49, %50 : vector<1x640xf32>
    %cst_20 = arith.constant 0.000000e+00 : f32
    %52 = vector.broadcast %cst_20 : f32 to vector<1x640xf32>
    %53 = arith.maximumf %51, %52 : vector<1x640xf32>
    %54 = vector.broadcast %47 : vector<1x640xf32> to vector<8x640xf32>
    %55 = arith.subf %40, %54 : vector<8x640xf32>
    %cst_21 = arith.constant 9.99999974E-6 : f32
    %56 = vector.broadcast %cst_21 : f32 to vector<1x640xf32>
    %57 = arith.addf %53, %56 : vector<1x640xf32>
    %58 = math.rsqrt %57 : vector<1x640xf32>
    %59 = vector.broadcast %58 : vector<1x640xf32> to vector<8x640xf32>
    %60 = arith.mulf %55, %59 : vector<8x640xf32>
    %c0_22 = arith.constant 0 : index
    %c0_23 = arith.constant 0 : index
    %61 = vector.load %arg6[%c0_22, %c0_23] : memref<1x640xf32, #tpu.memory_space<vmem>>, vector<1x640xf32>
    %62 = vector.broadcast %61 : vector<1x640xf32> to vector<8x640xf32>
    %63 = arith.mulf %60, %62 : vector<8x640xf32>
    %c0_24 = arith.constant 0 : index
    %c0_25 = arith.constant 0 : index
    %64 = vector.load %arg7[%c0_24, %c0_25] : memref<1x640xf32, #tpu.memory_space<vmem>>, vector<1x640xf32>
    %65 = vector.broadcast %64 : vector<1x640xf32> to vector<8x640xf32>
    %66 = arith.addf %63, %65 : vector<8x640xf32>
    %c0_26 = arith.constant 0 : index
    %c0_27 = arith.constant 0 : index
    %67 = vector.load %arg8[%c0_26, %c0_27] : memref<640x128xf32, #tpu.memory_space<vmem>>, vector<640x128xf32>
    %cst_28 = arith.constant dense<0.000000e+00> : vector<8x128xf32>
    %68 = tpu.matmul %66, %67, %cst_28 {dimension_numbers = #tpu.dot_dimension_numbers<[1], [0], [0], [1], [0, 0, 1, 1], [], []>} : vector<8x640xf32>, vector<640x128xf32>, vector<8x128xf32> -> vector<8x128xf32>
    %c0_29 = arith.constant 0 : index
    %c0_30 = arith.constant 0 : index
    %69 = vector.load %arg9[%c0_29, %c0_30] : memref<1x128xf32, #tpu.memory_space<vmem>>, vector<1x128xf32>
    %70 = vector.broadcast %69 : vector<1x128xf32> to vector<8x128xf32>
    %71 = arith.addf %68, %70 : vector<8x128xf32>
    %cst_31 = arith.constant 0.000000e+00 : f32
    %72 = vector.broadcast %cst_31 : f32 to vector<8x128xf32>
    %73 = arith.maximumf %71, %72 : vector<8x128xf32>
    %c0_32 = arith.constant 0 : index
    %c0_33 = arith.constant 0 : index
    %74 = vector.load %arg10[%c0_32, %c0_33] : memref<128x128xf32, #tpu.memory_space<vmem>>, vector<128x128xf32>
    %cst_34 = arith.constant dense<0.000000e+00> : vector<8x128xf32>
    %75 = tpu.matmul %73, %74, %cst_34 {dimension_numbers = #tpu.dot_dimension_numbers<[1], [0], [0], [1], [0, 0, 1, 1], [], []>} : vector<8x128xf32>, vector<128x128xf32>, vector<8x128xf32> -> vector<8x128xf32>
    %c0_35 = arith.constant 0 : index
    %c0_36 = arith.constant 0 : index
    %76 = vector.load %arg11[%c0_35, %c0_36] : memref<1x128xf32, #tpu.memory_space<vmem>>, vector<1x128xf32>
    %77 = vector.broadcast %76 : vector<1x128xf32> to vector<8x128xf32>
    %78 = arith.addf %75, %77 : vector<8x128xf32>
    %79 = math.absf %78 : vector<8x128xf32>
    %cst_37 = arith.constant 0.000000e+00 : f32
    %80 = vector.broadcast %cst_37 : f32 to vector<8x128xf32>
    %81 = arith.subf %80, %79 : vector<8x128xf32>
    %82 = math.exp %81 : vector<8x128xf32>
    %cst_38 = arith.constant 1.000000e+00 : f32
    %83 = vector.broadcast %cst_38 : f32 to vector<8x128xf32>
    %84 = arith.addf %83, %82 : vector<8x128xf32>
    %85 = tpu.reciprocal %84 {approx = true} : vector<8x128xf32> -> vector<8x128xf32>
    %cst_39 = arith.constant 0.000000e+00 : f32
    %86 = vector.broadcast %cst_39 : f32 to vector<8x128xf32>
    %87 = arith.cmpf oge, %78, %86 : vector<8x128xf32>
    %cst_40 = arith.constant 1.000000e+00 : f32
    %88 = vector.broadcast %cst_40 : f32 to vector<8x128xf32>
    %89 = arith.subf %88, %85 : vector<8x128xf32>
    %90 = arith.select %87, %85, %89 : vector<8x128xi1>, vector<8x128xf32>
    %c0_41 = arith.constant 0 : index
    %c0_42 = arith.constant 0 : index
    %91 = vector.load %arg12[%c0_41, %c0_42] : memref<8x128xf32, #tpu.memory_space<vmem>>, vector<8x128xf32>
    tpu.vector_store %arg12[%c0_41, %c0_42], %90 {strides = array<i32>} : memref<8x128xf32, #tpu.memory_space<vmem>>, vector<8x128xf32>,
    return
  }
  func.func @transform_0(%arg0: i32) -> (i32, i32) {
    %c0_i32 = arith.constant 0 : i32
    %c0_i32_0 = arith.constant 0 : i32
    %c0_i32_1 = arith.constant 0 : i32
    return %c0_i32, %c0_i32_0 : i32, i32
  }
  func.func @transform_1(%arg0: i32) -> (i32, i32) {
    %c0_i32 = arith.constant 0 : i32
    %c0_i32_0 = arith.constant 0 : i32
    %c0_i32_1 = arith.constant 0 : i32
    return %c0_i32, %c0_i32_0 : i32, i32
  }
  func.func @transform_2(%arg0: i32) -> (i32, i32) {
    %c0_i32 = arith.constant 0 : i32
    %c0_i32_0 = arith.constant 0 : i32
    %c0_i32_1 = arith.constant 0 : i32
    return %c0_i32, %c0_i32_0 : i32, i32
  }
  func.func @transform_3(%arg0: i32) -> (i32, i32) {
    %c0_i32 = arith.constant 0 : i32
    %c0_i32_0 = arith.constant 0 : i32
    %c0_i32_1 = arith.constant 0 : i32
    return %c0_i32, %c0_i32_0 : i32, i32
  }
  func.func @transform_4(%arg0: i32) -> (i32, i32) {
    %c0_i32 = arith.constant 0 : i32
    %c0_i32_0 = arith.constant 0 : i32
    %c0_i32_1 = arith.constant 0 : i32
    return %c0_i32, %c0_i32_0 : i32, i32
  }
  func.func @transform_5(%arg0: i32) -> (i32, i32) {
    %c0_i32 = arith.constant 0 : i32
    %c0_i32_0 = arith.constant 0 : i32
    %c0_i32_1 = arith.constant 0 : i32
    return %c0_i32, %c0_i32_0 : i32, i32
  }
  func.func @transform_6(%arg0: i32) -> (i32, i32) {
    %c0_i32 = arith.constant 0 : i32
    %c0_i32_0 = arith.constant 0 : i32
    %c0_i32_1 = arith.constant 0 : i32
    return %c0_i32, %c0_i32_0 : i32, i32
  }
  func.func @transform_7(%arg0: i32) -> (i32, i32) {
    %c0_i32 = arith.constant 0 : i32
    %c0_i32_0 = arith.constant 0 : i32
    %c0_i32_1 = arith.constant 0 : i32
    return %c0_i32, %c0_i32_0 : i32, i32
  }
  func.func @transform_8(%arg0: i32) -> (i32, i32) {
    %c0_i32 = arith.constant 0 : i32
    %c0_i32_0 = arith.constant 0 : i32
    %c0_i32_1 = arith.constant 0 : i32
    return %c0_i32, %c0_i32_0 : i32, i32
  }
  func.func @transform_9(%arg0: i32) -> (i32, i32) {
    %c0_i32 = arith.constant 0 : i32
    %c0_i32_0 = arith.constant 0 : i32
    %c0_i32_1 = arith.constant 0 : i32
    return %c0_i32, %c0_i32_0 : i32, i32
  }
  func.func @transform_10(%arg0: i32) -> (i32, i32) {
    %c0_i32 = arith.constant 0 : i32
    %c0_i32_0 = arith.constant 0 : i32
    %c0_i32_1 = arith.constant 0 : i32
    return %c0_i32, %c0_i32_0 : i32, i32
  }
  func.func @transform_11(%arg0: i32) -> (i32, i32) {
    %c0_i32 = arith.constant 0 : i32
    %c0_i32_0 = arith.constant 0 : i32
    %c0_i32_1 = arith.constant 0 : i32
    return %c0_i32, %c0_i32_0 : i32, i32
  }
}

</mosaic_0001>

<bundles_post_ra>
// kernel: _lambda_.2
= control target key start
LH: loop header
LB: loop body
LE: loop exit
PB: predicated region body
PF: predicated region fallthrough
CT: control target
= control target key end

     0   :  { %16 = vsyncpa [#allocation3], 0  ;;  %s1300_s0 = inlined_call_operand.vmem [shape: f32[8,32], index: 0, kind: input, shape index: {}]   ;;  %s1301_s1 = inlined_call_operand.hbm [shape: f32[32,512], index: 1, kind: input, shape index: {}]   ;;  %s1302_s2 = inlined_call_operand.hbm [shape: f32[128,128], index: 2, kind: input, shape index: {}]   ;;  %s1303_s3 = inlined_call_operand.hbm [shape: f32[128,128], index: 3, kind: input, shape index: {}]   ;;  %s1304_s4 = inlined_call_operand.vmem [shape: f32[1,128], index: 4, kind: input, shape index: {}]   ;;  %s1305_s5 = inlined_call_operand.vmem [shape: f32[1,640], index: 5, kind: input, shape index: {}]   ;;  %s1306_s6 = inlined_call_operand.vmem [shape: f32[1,640], index: 6, kind: input, shape index: {}]   ;;  %s1307_s7 = inlined_call_operand.hbm [shape: f32[640,128], index: 7, kind: input, shape index: {}]   ;;  %s1308_s8 = inlined_call_operand.vmem [shape: f32[1,128], index: 8, kind: input, shape index: {}, may-alias: {8,10}]   ;;  %s1309_s9 = inlined_call_operand.hbm [shape: f32[128,128], index: 9, kind: input, shape index: {}]   ;;  %s1310_s10 = inlined_call_operand.vmem [shape: f32[1,128], index: 10, kind: input, shape index: {}, may-alias: {8,10}]   ;;  %s1311_s11 = inlined_call_operand.vmem [shape: f32[8,128], index: 11, kind: output, shape index: {}]  }
   0x1   :  { %17 = vsyncpa [#allocation5], 0  ;;  %s38_s19 = sshll.u32 %s1302_s2, 4  ;;  %s39_s19 = int_to_ptr.hbm [resolvable:$true] %s38_s19 }
   0x2   :  { %18 = vsyncpa [#allocation8], 0  ;;  %s992_s20 = smov [#allocation4]   ;;  %s70_s24 = sshll.u32 %s1307_s7, 4  ;;  %s71_s24 = int_to_ptr.hbm [resolvable:$true] %s70_s24 }
   0x3   :  { %s40_s21 = sshll.u32 %s992_s20, 4  ;;  %s993_s25 = smov 128   ;;  %s41_s21 = int_to_ptr.vmem [resolvable:$true] %s40_s21 }
   0x4   :  { %s994_s26 = smov 8   ;;  %s995_s27 = smov [#allocation7]  }
   0x5   :  { %46 = dma.hbm_to_vmem [thread:$0]  %s39_s19, 2048, %s41_s21, [#allocation5], %s993_s25, %s993_s25, %s994_s26  }
   0x6   :  { %s72_s28 = sshll.u32 %s995_s27, 4  ;;  %s25_s30 = sshll.u32 %s1301_s1, 4  ;;  %s73_s28 = int_to_ptr.vmem [resolvable:$true] %s72_s28  ;;  %s26_s30 = int_to_ptr.hbm [resolvable:$true] %s25_s30 }
   0x7   :  { %78 = dma.hbm_to_vmem [thread:$0]  %s71_s24, 10240, %s73_s28, [#allocation8], %s993_s25, %s993_s25, %s994_s26  }
   0x8   :  { %s996_s7 = smov [#allocation2]   ;;  %s51_s15 = sshll.u32 %s1303_s3, 4  ;;  %s52_s15 = int_to_ptr.hbm [resolvable:$true] %s51_s15 }
   0x9   :  { %s27_s12 = sshll.u32 %s996_s7, 4  ;;  %s997_s16 = smov 512   ;;  %s28_s12 = int_to_ptr.vmem [resolvable:$true] %s27_s12 }
   0xa   :  { %s998_s17 = smov 32   ;;  %s999_s18 = smov [#allocation6]  }
   0xb   :  { %33 = dma.hbm_to_vmem [thread:$0]  %s26_s30, 2048, %s28_s12, [#allocation3], %s997_s16, %s997_s16, %s998_s17  }
   0xc   :  { %s53_s19 = sshll.u32 %s999_s18, 4  ;;  %s85_s21 = sshll.u32 %s1309_s9, 4  ;;  %s54_s19 = int_to_ptr.vmem [resolvable:$true] %s53_s19  ;;  %s86_s21 = int_to_ptr.hbm [resolvable:$true] %s85_s21 }
   0xd   :  { %59 = dma.hbm_to_vmem [thread:$0]  %s52_s15, 2048, %s54_s19, [#allocation5], %s993_s25, %s993_s25, %s994_s26  }
   0xe   :  { %s1000_s22 = smov [#allocation9]  }
   0xf   :  { %s87_s23 = sshll.u32 %s1000_s22, 4  ;;  %s88_s23 = int_to_ptr.vmem [resolvable:$true] %s87_s23 }
  0x10   :  { %93 = dma.hbm_to_vmem [thread:$0]  %s86_s21, 2048, %s88_s23, [#allocation8], %s993_s25, %s993_s25, %s994_s26  }
  0x11   :  { %986 = dma.done.wait [#allocation3], 2048  }
  0x12   :  { %987 = vsyncadd [#allocation3], 4294965248 }
  0x13   :  { %988 = dma.done.wait [#allocation5], 4096  }
  0x14   :  { %989 = vsyncadd [#allocation5], 4294963200 }
  0x15   :  { %990 = dma.done.wait [#allocation8], 12288  }
  0x16   :  { %991 = vsyncadd [#allocation8], 4294955008  ;;  %v129_v0 = vld [vmem:[#allocation2 + $0x60] sm:$0xff]  ;;  %v130_v1 = vld [vmem:[#allocation2 + $0x68] sm:$0xff]  ;;  %vm133_vm0 = vcmask 261120  }
  0x17   :  { %v131_v2 = vld [vmem:[#allocation2 + $0x70] sm:$0xff]  ;;  %149 = vmatpush.msra.mxu0 %v129_v0  ;;  %169 = vmatpush.msra.mxu1 %v130_v1  ;;  %v125_v3 = vld [vmem:[#allocation2 + $0x40] sm:$0xff]  ;;  %v126_v4 = vld [vmem:[#allocation2 + $0x48] sm:$0xff] }
  0x18   :  { %v127_v5 = vld [vmem:[#allocation2 + $0x50] sm:$0xff]  ;;  %189 = vmatpush.msra.mxu2 %v131_v2  ;;  %v132_v6 = vld [vmem:[#allocation2 + $0x78] sm:$0xff]  ;;  %v121_v7 = vld [vmem:[#allocation2 + $0x20] sm:$0xff] }
  0x19   :  { %v122_v8 = vld [vmem:[#allocation2 + $0x28] sm:$0xff]  ;;  %150 = vmatpush.msra.mxu0 %v125_v3  ;;  %170 = vmatpush.msra.mxu1 %v126_v4  ;;  %v123_v9 = vld [vmem:[#allocation2 + $0x30] sm:$0xff]  ;;  %v128_v10 = vld [vmem:[#allocation2 + $0x58] sm:$0xff] }
  0x1a   :  { %190 = vmatpush.msra.mxu2 %v127_v5  ;;  %209 = vmatpush.msra.mxu3 %v132_v6  ;;  %v117_v11 = vld [vmem:[#allocation2] sm:$0xff]  ;;  %v118_v12 = vld [vmem:[#allocation2 + $0x8] sm:$0xff]  ;;  %v119_v13 = vld [vmem:[#allocation2 + $0x10] sm:$0xff] }
  0x1b   :  { %151 = vmatpush.msra.mxu0 %v121_v7  ;;  %171 = vmatpush.msra.mxu1 %v122_v8  ;;  %v124_v14 = vld [vmem:[#allocation2 + $0x38] sm:$0xff]  ;;  %v116_v15 = vld [vmem:[%s1300_s0] sm:$0xff]  ;;  %v1093_v18 = vld [vmem:[#allocation4 + $0x70] sm:$0xff] }
  0x1c   :  { %191 = vmatpush.msra.mxu2 %v123_v9  ;;  %210 = vmatpush.msra.mxu3 %v128_v10  ;;  %v120_v16 = vld [vmem:[#allocation2 + $0x18] sm:$0xff]  ;;  %v1096_v19 = vld [vmem:[#allocation4 + $0x68] sm:$0xff]  ;;  %v1102_v20 = vld [vmem:[#allocation4 + $0x60] sm:$0xff] }
  0x1d   :  { %152 = vmatpush.msra.mxu0 %v117_v11  ;;  %172 = vmatpush.msra.mxu1 %v118_v12  ;;  %v1091_v17 = vld [vmem:[#allocation4 + $0x78] sm:$0xff]  ;;  %v1114_v22 = vld [vmem:[#allocation4 + $0x50] sm:$0xff]  ;;  %v1120_v23 = vld [vmem:[#allocation4 + $0x48] sm:$0xff] }
  0x1e   :  { %192 = vmatpush.msra.mxu2 %v119_v13  ;;  %211 = vmatpush.msra.mxu3 %v124_v14  ;;  %v1108_v21 = vld [vmem:[#allocation4 + $0x58] sm:$0xff]  ;;  %v1126_v24 = vld [vmem:[#allocation4 + $0x40] sm:$0xff]  ;;  %v1138_v26 = vld [vmem:[#allocation4 + $0x30] sm:$0xff] }
  0x1f   :  { %834 = vmatmul.msk.f32.vlgmr.msra.gmra.mxu0 %vm133_vm0, %v116_v15  ;;  %835 = vmatmul.msk.f32.vlgmr.msra.gmra.mxu1 %vm133_vm0, %v116_v15  ;;  %v1132_v25 = vld [vmem:[#allocation4 + $0x38] sm:$0xff]  ;;  %v1144_v27 = vld [vmem:[#allocation4 + $0x28] sm:$0xff]  ;;  %v1150_v28 = vld [vmem:[#allocation4 + $0x20] sm:$0xff] }
  0x20   :  { %836 = vmatmul.msk.f32.vlgmr.msra.gmra.mxu2 %vm133_vm0, %v116_v15  ;;  %212 = vmatpush.msra.mxu3 %v120_v16  ;;  %v240_v29 = vld [vmem:[#allocation4 + $0x18] sm:$0xff]  ;;  %v239_v30 = vld [vmem:[#allocation4 + $0x10] sm:$0xff]  ;;  %v238_v31 = vld [vmem:[#allocation4 + $0x8] sm:$0xff] }
  0x21   :  { %837 = vmatmul.msk.f32.vlgmr.msra.gmra.mxu3 %vm133_vm0, %v116_v15  ;;  %273 = vmatpush.msrb.mxu1 %v1091_v17  ;;  %v237_v32 = vld [vmem:[#allocation4] sm:$0xff]  ;;  %v368_v33 = vld [vmem:[#allocation6 + $0x78] sm:$0xff]  ;;  %v367_v34 = vld [vmem:[#allocation6 + $0x70] sm:$0xff] }
  0x22   :  { %253 = vmatpush.msrb.mxu0 %v1091_v17  ;;  %293 = vmatpush.msrb.mxu2 %v1091_v17  ;;  %v366_v35 = vld [vmem:[#allocation6 + $0x68] sm:$0xff]  ;;  %v365_v36 = vld [vmem:[#allocation6 + $0x60] sm:$0xff]  ;;  %v364_v37 = vld [vmem:[#allocation6 + $0x58] sm:$0xff] }
  0x23   :  { %274 = vmatpush.msrb.mxu1 %v1093_v18  ;;  %313 = vmatpush.msrb.mxu3 %v1091_v17  ;;  %v363_v38 = vld [vmem:[#allocation6 + $0x50] sm:$0xff]  ;;  %v362_v39 = vld [vmem:[#allocation6 + $0x48] sm:$0xff]  ;;  %v361_v40 = vld [vmem:[#allocation6 + $0x40] sm:$0xff] }
  0x24   :  { %254 = vmatpush.msrb.mxu0 %v1093_v18  ;;  %294 = vmatpush.msrb.mxu2 %v1093_v18  ;;  %v360_v41 = vld [vmem:[#allocation6 + $0x38] sm:$0xff]  ;;  %v359_v42 = vld [vmem:[#allocation6 + $0x30] sm:$0xff]  ;;  %v358_v43 = vld [vmem:[#allocation6 + $0x28] sm:$0xff] }
  0x25   :  { %275 = vmatpush.msrb.mxu1 %v1096_v19  ;;  %314 = vmatpush.msrb.mxu3 %v1093_v18  ;;  %v357_v44 = vld [vmem:[#allocation6 + $0x20] sm:$0xff]  ;;  %v356_v45 = vld [vmem:[#allocation6 + $0x18] sm:$0xff]  ;;  %v355_v46 = vld [vmem:[#allocation6 + $0x10] sm:$0xff] }
  0x26   :  { %255 = vmatpush.msrb.mxu0 %v1096_v19  ;;  %295 = vmatpush.msrb.mxu2 %v1096_v19  ;;  %v354_v47 = vld [vmem:[#allocation6 + $0x8] sm:$0xff]  ;;  %v353_v48 = vld [vmem:[#allocation6] sm:$0xff]  ;;  %v607_v49 = vld [vmem:[#allocation7 + $0x78] sm:$0xff] }
  0x27   :  { %276 = vmatpush.msrb.mxu1 %v1102_v20  ;;  %315 = vmatpush.msrb.mxu3 %v1096_v19  ;;  %v606_v50 = vld [vmem:[#allocation7 + $0x70] sm:$0xff]  ;;  %v605_v51 = vld [vmem:[#allocation7 + $0x68] sm:$0xff]  ;;  %v604_v52 = vld [vmem:[#allocation7 + $0x60] sm:$0xff] }
  0x28   :  { %256 = vmatpush.msrb.mxu0 %v1102_v20  ;;  %296 = vmatpush.msrb.mxu2 %v1102_v20  ;;  %v603_v57 = vld [vmem:[#allocation7 + $0x58] sm:$0xff]  ;;  %v602_v61 = vld [vmem:[#allocation7 + $0x50] sm:$0xff]  ;;  %v601_v0 = vld [vmem:[#allocation7 + $0x48] sm:$0xff] }
  0x29   :  { %277 = vmatpush.msrb.mxu1 %v1108_v21  ;;  %316 = vmatpush.msrb.mxu3 %v1102_v20  ;;  %v600_v5 = vld [vmem:[#allocation7 + $0x40] sm:$0xff]  ;;  %v599_v10 = vld [vmem:[#allocation7 + $0x38] sm:$0xff]  ;;  %v598_v15 = vld [vmem:[#allocation7 + $0x30] sm:$0xff] }
  0x2a   :  { %257 = vmatpush.msrb.mxu0 %v1108_v21  ;;  %297 = vmatpush.msrb.mxu2 %v1108_v21 }
  0x2b   :  { %278 = vmatpush.msrb.mxu1 %v1114_v22  ;;  %317 = vmatpush.msrb.mxu3 %v1108_v21 }
  0x2c   :  { %258 = vmatpush.msrb.mxu0 %v1114_v22  ;;  %298 = vmatpush.msrb.mxu2 %v1114_v22 }
  0x2d   :  { %279 = vmatpush.msrb.mxu1 %v1120_v23  ;;  %318 = vmatpush.msrb.mxu3 %v1114_v22 }
  0x2e   :  { %259 = vmatpush.msrb.mxu0 %v1120_v23  ;;  %299 = vmatpush.msrb.mxu2 %v1120_v23 }
  0x2f   :  { %280 = vmatpush.msrb.mxu1 %v1126_v24  ;;  %319 = vmatpush.msrb.mxu3 %v1120_v23 }
  0x30   :  { %260 = vmatpush.msrb.mxu0 %v1126_v24  ;;  %300 = vmatpush.msrb.mxu2 %v1126_v24 }
  0x31   :  { %281 = vmatpush.msrb.mxu1 %v1132_v25  ;;  %320 = vmatpush.msrb.mxu3 %v1126_v24 }
  0x32   :  { %261 = vmatpush.msrb.mxu0 %v1132_v25  ;;  %301 = vmatpush.msrb.mxu2 %v1132_v25 }
  0x33   :  { %282 = vmatpush.msrb.mxu1 %v1138_v26  ;;  %321 = vmatpush.msrb.mxu3 %v1132_v25 }
  0x34   :  { %262 = vmatpush.msrb.mxu0 %v1138_v26  ;;  %302 = vmatpush.msrb.mxu2 %v1138_v26 }
  0x35   :  { %283 = vmatpush.msrb.mxu1 %v1144_v27  ;;  %322 = vmatpush.msrb.mxu3 %v1138_v26 }
  0x36   :  { %263 = vmatpush.msrb.mxu0 %v1144_v27  ;;  %303 = vmatpush.msrb.mxu2 %v1144_v27 }
  0x37   :  { %284 = vmatpush.msrb.mxu1 %v1150_v28  ;;  %323 = vmatpush.msrb.mxu3 %v1144_v27 }
  0x38   :  { %264 = vmatpush.msrb.mxu0 %v1150_v28  ;;  %304 = vmatpush.msrb.mxu2 %v1150_v28 }
  0x39   :  { %285 = vmatpush.msrb.mxu1 %v240_v29  ;;  %324 = vmatpush.msrb.mxu3 %v1150_v28 }
  0x3a   :  { %265 = vmatpush.msrb.mxu0 %v240_v29  ;;  %305 = vmatpush.msrb.mxu2 %v240_v29 }
  0x3b   :  { %286 = vmatpush.msrb.mxu1 %v239_v30  ;;  %325 = vmatpush.msrb.mxu3 %v240_v29 }
  0x3c   :  { %266 = vmatpush.msrb.mxu0 %v239_v30  ;;  %306 = vmatpush.msrb.mxu2 %v239_v30 }
  0x3d   :  { %287 = vmatpush.msrb.mxu1 %v238_v31  ;;  %326 = vmatpush.msrb.mxu3 %v239_v30 }
  0x3e   :  { %267 = vmatpush.msrb.mxu0 %v238_v31  ;;  %307 = vmatpush.msrb.mxu2 %v238_v31 }
  0x3f   :  { %288 = vmatpush.msrb.mxu1 %v237_v32  ;;  %327 = vmatpush.msrb.mxu3 %v238_v31 }
  0x40   :  { %268 = vmatpush.msrb.mxu0 %v237_v32  ;;  %308 = vmatpush.msrb.mxu2 %v237_v32 }
  0x41   :  { %369 = vmatpush.msra.mxu1 %v368_v33  ;;  %328 = vmatpush.msrb.mxu3 %v237_v32 }
  0x42   :  { %333 = vmatpush.msra.mxu0 %v1091_v17  ;;  %676 = vmatpush.msra.mxu2 %v607_v49  ;;  %v593_v49 = vld [vmem:[#allocation7 + $0x8] sm:$0xff] }
  0x43   :  { %370 = vmatpush.msra.mxu1 %v367_v34 }
  0x44   :  { %334 = vmatpush.msra.mxu0 %v1093_v18  ;;  %677 = vmatpush.msra.mxu2 %v606_v50  ;;  %v639_v18 = vld [vmem:[#allocation7 + $0x178] sm:$0xff] }
  0x45   :  { %371 = vmatpush.msra.mxu1 %v366_v35  ;;  %v595_v35 = vld [vmem:[#allocation7 + $0x18] sm:$0xff] }
  0x46   :  { %335 = vmatpush.msra.mxu0 %v1096_v19  ;;  %678 = vmatpush.msra.mxu2 %v605_v51  ;;  %v634_v51 = vld [vmem:[#allocation7 + $0x150] sm:$0xff] }
  0x47   :  { %372 = vmatpush.msra.mxu1 %v365_v36  ;;  %v620_v36 = vld [vmem:[#allocation7 + $0xe0] sm:$0xff] }
  0x48   :  { %336 = vmatpush.msra.mxu0 %v1102_v20  ;;  %679 = vmatpush.msra.mxu2 %v604_v52  ;;  %v623_v20 = vld [vmem:[#allocation7 + $0xf8] sm:$0xff]  ;;  %v618_v52 = vld [vmem:[#allocation7 + $0xd0] sm:$0xff] }
  0x49   :  { %373 = vmatpush.msra.mxu1 %v364_v37  ;;  %696 = vmatpush.msra.mxu3 %v623_v20 }
  0x4a   :  { %337 = vmatpush.msra.mxu0 %v1108_v21  ;;  %680 = vmatpush.msra.mxu2 %v603_v57  ;;  %v592_v57 = vld [vmem:[#allocation7] sm:$0xff] }
  0x4b   :  { %374 = vmatpush.msra.mxu1 %v363_v38 }
  0x4c   :  { %338 = vmatpush.msra.mxu0 %v1114_v22  ;;  %681 = vmatpush.msra.mxu2 %v602_v61 }
  0x4d   :  { %375 = vmatpush.msra.mxu1 %v362_v39  ;;  %v636_v39 = vld [vmem:[#allocation7 + $0x160] sm:$0xff] }
  0x4e   :  { %339 = vmatpush.msra.mxu0 %v1120_v23  ;;  %682 = vmatpush.msra.mxu2 %v601_v0  ;;  %v638_v23 = vld [vmem:[#allocation7 + $0x170] sm:$0xff] }
  0x4f   :  { %376 = vmatpush.msra.mxu1 %v361_v40 }
  0x50   :  { %340 = vmatpush.msra.mxu0 %v1126_v24  ;;  %683 = vmatpush.msra.mxu2 %v600_v5  ;;  %v631_v5 = vld [vmem:[#allocation7 + $0x138] sm:$0xff] }
  0x51   :  { %377 = vmatpush.msra.mxu1 %v360_v41 }
  0x52   :  { %341 = vmatpush.msra.mxu0 %v1132_v25  ;;  %684 = vmatpush.msra.mxu2 %v599_v10 }
  0x53   :  { %378 = vmatpush.msra.mxu1 %v359_v42 }
  0x54   :  { %342 = vmatpush.msra.mxu0 %v1138_v26  ;;  %685 = vmatpush.msra.mxu2 %v598_v15 }
  0x55   :  { %379 = vmatpush.msra.mxu1 %v358_v43  ;;  %v594_v43 = vld [vmem:[#allocation7 + $0x10] sm:$0xff] }
  0x56   :  { %343 = vmatpush.msra.mxu0 %v1144_v27  ;;  %v597_v27 = vld [vmem:[#allocation7 + $0x28] sm:$0xff] }
  0x57   :  { %380 = vmatpush.msra.mxu1 %v357_v44  ;;  %686 = vmatpush.msra.mxu2 %v597_v27  ;;  %v635_v44 = vld [vmem:[#allocation7 + $0x158] sm:$0xff] }
  0x58   :  { %344 = vmatpush.msra.mxu0 %v1150_v28  ;;  %v622_v28 = vld [vmem:[#allocation7 + $0xf0] sm:$0xff] }
  0x59   :  { %381 = vmatpush.msra.mxu1 %v356_v45  ;;  %697 = vmatpush.msra.mxu3 %v622_v28  ;;  %v619_v45 = vld [vmem:[#allocation7 + $0xd8] sm:$0xff] }
  0x5a   :  { %345 = vmatpush.msra.mxu0 %v240_v29  ;;  %v596_v29 = vld [vmem:[#allocation7 + $0x20] sm:$0xff] }
  0x5b   :  { %382 = vmatpush.msra.mxu1 %v355_v46  ;;  %687 = vmatpush.msra.mxu2 %v596_v29  ;;  %v628_v29 = vld [vmem:[#allocation7 + $0x120] sm:$0xff] }
  0x5c   :  { %346 = vmatpush.msra.mxu0 %v239_v30 }
  0x5d   :  { %383 = vmatpush.msra.mxu1 %v354_v47  ;;  %688 = vmatpush.msra.mxu2 %v595_v35 }
  0x5e   :  { %347 = vmatpush.msra.mxu0 %v238_v31  ;;  %v637_v31 = vld [vmem:[#allocation7 + $0x168] sm:$0xff] }
  0x5f   :  { %384 = vmatpush.msra.mxu1 %v353_v48  ;;  %689 = vmatpush.msra.mxu2 %v594_v43 }
  0x60   :  { %348 = vmatpush.msra.mxu0 %v237_v32  ;;  %v621_v32 = vld [vmem:[#allocation7 + $0xe8] sm:$0xff] }
  0x61   :  { %698 = vmatpush.msra.mxu3 %v621_v32  ;;  %690 = vmatpush.msra.mxu2 %v593_v49  ;;  %v625_v49 = vld [vmem:[#allocation7 + $0x108] sm:$0xff] }
  0x63   :  { %699 = vmatpush.msra.mxu3 %v620_v36  ;;  %691 = vmatpush.msra.mxu2 %v592_v57  ;;  %v1237_v36 = vld [vmem:[%s1305_s5] sm:$0x1f] }
  0x65   :  { %700 = vmatpush.msra.mxu3 %v619_v45  ;;  %v610_v45 = vld [vmem:[#allocation7 + $0x90] sm:$0xff] }
  0x67   :  { %701 = vmatpush.msra.mxu3 %v618_v52  ;;  %v609_v52 = vld [vmem:[#allocation7 + $0x88] sm:$0xff] }
  0x9c   :  { %v1175_v53 = vpop.f32.mrf.mxu0  ;;  %v1177_v54 = vpop.f32.mrf.mxu1 }
  0x9d   :  { %v416_v55 = vrot.slane %v1175_v53, 4  ;;  %v217_v56 = vmul.f32 %v1175_v53, %v1175_v53  ;;  %289 = vmatmul.f32.vlgmr.msrb.gmra.mxu1 %v1175_v53  ;;  %309 = vmatmul.f32.vlgmr.msrb.gmra.mxu2 %v1177_v54  ;;  %v218_v58 = vmul.f32 %v1177_v54, %v1177_v54 }
  0x9f   :  { %v417_v59 = vadd.f32 %v416_v55, %v1175_v53  ;;  %v450_v60 = vrot.slane %v217_v56, 4  ;;  %v219_v1 = vsub.f32 %v217_v56, %v218_v58 }
  0xa1   :  { %v418_v62 = vrot.slane %v417_v59, 2  ;;  %v451_v63 = vadd.f32 %v450_v60, %v217_v56 }
  0xa3   :  { %v419_v2 = vadd.f32 %v418_v62, %v417_v59  ;;  %v452_v3 = vrot.slane %v451_v63, 2  ;;  %v1187_v4 = vpop.f32.mrf.mxu2  ;;  %v633_v59 = vld [vmem:[#allocation7 + $0x148] sm:$0xff] }
  0xa4   :  { %v220_v6 = vmul.f32 %v1187_v4, %v1187_v4  ;;  %329 = vmatmul.f32.vlgmr.msrb.gmra.mxu3 %v1187_v4  ;;  %v1192_v7 = vpop.f32.mrf.mxu3 }
  0xa5   :  { %v453_v8 = vadd.f32 %v452_v3, %v451_v63  ;;  %v222_v9 = vmul.f32 %v1192_v7, %v1192_v7  ;;  %385 = vmatmul.f32.vlgmr.msra.gmra.mxu1 %v1175_v53  ;;  %v420_v11 = vrot.slane %v419_v2, 1  ;;  %v632_v63 = vld [vmem:[#allocation7 + $0x140] sm:$0xff] }
  0xa6   :  { %v221_v12 = vsub.f32 %v219_v1, %v220_v6  ;;  %v1197_v13 = vadd.f32 %v220_v6, %v218_v58 }
  0xa7   :  { %v454_v14 = vrot.slane %v453_v8, 1  ;;  %v421_v16 = vadd.f32 %v420_v11, %v419_v2  ;;  %v617_v2 = vld [vmem:[#allocation7 + $0xc8] sm:$0xff]  ;;  %v615_v11 = vld [vmem:[#allocation7 + $0xb8] sm:$0xff] }
  0xa8   :  { %850 = vrsqrt.f32 %v1197_v13  ;;  %v1200_v17 = vsub.f32 %v221_v12, %v222_v9  ;;  %702 = vmatpush.msra.mxu3 %v617_v2  ;;  %v616_v9 = vld [vmem:[#allocation7 + $0xc0] sm:$0xff]  ;;  %vm232_vm1 = vcmp.eq.f32.partialorder %v1197_v13, inf  ;;  %vm234_vm2 = vcmp.eq.f32.partialorder %v1197_v13, 0.0 }
  0xa9   :  { %v455_v19 = vadd.f32 %v454_v14, %v453_v8  ;;  %v1202_v21 = vmul.f32 0.25, %v421_v16  ;;  %v630_v14 = vld [vmem:[#allocation7 + $0x130] sm:$0xff] }
  0xaa   :  { %v434_v22 = vmul.f32 %v1200_v17, %v1200_v17  ;;  %269 = vmatmul.f32.vlgmr.msrb.gmra.mxu0 %v1200_v17  ;;  %v404_v24 = vrot.slane %v1200_v17, 4  ;;  %703 = vmatpush.msra.mxu3 %v616_v9 }
  0xab   :  { %v475_v25 = vmul.f32 0.25, %v455_v19  ;;  %716 = vmatpush.msrb.mxu0 %v639_v18  ;;  %v480_v26 = vmul.f32 %v1202_v21, %v1202_v21  ;;  %v235_v18 = vand.u32 2147483648, %v1197_v13  ;;  %v614_v19 = vld [vmem:[#allocation7 + $0xb0] sm:$0xff]  ;;  %v495_v43 = vsub.f32 %v1175_v53, %v1202_v21 }
  0xac   :  { %v438_v30 = vrot.slane %v434_v22, 4  ;;  %v405_v33 = vadd.f32 %v404_v24, %v1200_v17  ;;  %704 = vmatpush.msra.mxu3 %v615_v11 }
  0xad   :  { %717 = vmatpush.msrb.mxu0 %v638_v23  ;;  %v485_v34 = vsub.f32 %v475_v25, %v480_v26  ;;  %v613_v26 = vld [vmem:[#allocation7 + $0xa8] sm:$0xff] }
  0xae   :  { %v851_v37 = vpop.eup %850  ;;  %v439_v38 = vadd.f32 %v438_v30, %v434_v22  ;;  %v406_v40 = vrot.slane %v405_v33, 2  ;;  %v629_v22 = vld [vmem:[#allocation7 + $0x128] sm:$0xff]  ;;  %705 = vmatpush.msra.mxu3 %v614_v19 }
  0xaf   :  { %v226_v41 = vmul.f32 %v851_v37, %v1197_v13  ;;  %718 = vmatpush.msrb.mxu0 %v637_v31  ;;  %v490_v42 = vmax.f32 %v485_v34, 0.0  ;;  %v627_v34 = vld [vmem:[#allocation7 + $0x118] sm:$0xff] }
  0xb0   :  { %v407_v46 = vadd.f32 %v406_v40, %v405_v33  ;;  %v440_v47 = vrot.slane %v439_v38, 2  ;;  %706 = vmatpush.msra.mxu3 %v613_v26  ;;  %v626_v40 = vld [vmem:[#allocation7 + $0x110] sm:$0xff] }
  0xb1   :  { %719 = vmatpush.msrb.mxu0 %v636_v39  ;;  %v1212_v48 = vadd.f32 1e-05, %v490_v42  ;;  %v227_v50 = vmul.f32 %v851_v37, %v226_v41  ;;  %v1244_v42 = vld [vmem:[%s1306_s6] sm:$0x1f] }
  0xb2   :  { %349 = vmatmul.f32.vlgmr.msra.gmra.mxu0 %v1192_v7  ;;  %v408_v55 = vrot.slane %v407_v46, 1  ;;  %v441_v56 = vadd.f32 %v440_v47, %v439_v38  ;;  %v577_v19 = vperm.slane %v1244_v42, 0 }
  0xb3   :  { %720 = vmatpush.msrb.mxu0 %v635_v44  ;;  %852 = vrsqrt.f32 %v1212_v48  ;;  %v228_v58 = vmul.f32 0.5, %v227_v50  ;;  %vm529_vm4 = vweird.f32 %v1212_v48  ;;  %v562_v44 = vperm.slane %v1237_v36, 2 }
  0xb4   :  { %v409_v60 = vadd.f32 %v408_v55, %v407_v46  ;;  %v442_v61 = vrot.slane %v441_v56, 1 }
  0xb5   :  { %721 = vmatpush.msrb.mxu0 %v634_v51  ;;  %v229_v62 = vsub.f32 1.5, %v228_v58  ;;  %v579_v51 = vperm.slane %v1244_v42, 2  ;;  %v624_v58 = vld [vmem:[#allocation7 + $0x100] sm:$0xff] }
  0xb6   :  { %v443_v0 = vadd.f32 %v442_v61, %v441_v56  ;;  %v1216_v1 = vmul.f32 0.25, %v409_v60  ;;  %v608_v60 = vld [vmem:[#allocation7 + $0x80] sm:$0xff] }
  0xb7   :  { %722 = vmatpush.msrb.mxu0 %v633_v59  ;;  %v230_v3 = vmul.f32 %v851_v37, %v229_v62  ;;  %v611_v37 = vld [vmem:[#allocation7 + $0x98] sm:$0xff] }
  0xb8   :  { %v473_v6 = vmul.f32 0.25, %v443_v0  ;;  %v478_v8 = vmul.f32 %v1216_v1, %v1216_v1 }
  0xb9   :  { %v853_v10 = vpop.eup %852  ;;  %723 = vmatpush.msrb.mxu0 %v632_v63  ;;  %v231_v12 = vmul.f32 %v230_v3, %v1197_v13 }
  0xba   :  { %v524_v15 = vmul.f32 %v853_v10, %v1212_v48  ;;  %v483_v16 = vsub.f32 %v473_v6, %v478_v8  ;;  %vm530_vm3 = vweird.f32 %v853_v10 }
  0xbb   :  { %724 = vmatpush.msrb.mxu0 %v631_v5  ;;  %v233_v20 = vsel %vm232_vm1, %v1197_v13, %v231_v12  ;;  %v612_v13 = vld [vmem:[#allocation7 + $0xa0] sm:$0xff]  ;;  %vm531_vm5 = vmor %vm529_vm4, %vm530_vm3  ;;  %v493_v12 = vsub.f32 %v1200_v17, %v1216_v1 }
  0xbc   :  { %v525_v23 = vmul.f32 %v853_v10, %v524_v15  ;;  %v488_v24 = vmax.f32 %v483_v16, 0.0  ;;  %v1226_v25 = vsel %vm234_vm2, %v235_v18, %v233_v20  ;;  %707 = vmatpush.msra.mxu3 %v612_v13 }
  0xbd   :  { %725 = vmatpush.msrb.mxu0 %v630_v14  ;;  %v410_v27 = vrot.slane %v1226_v25, 4  ;;  %v435_v28 = vmul.f32 %v1226_v25, %v1226_v25  ;;  %v560_v14 = vperm.slane %v1237_v36, 0 }
  0xbe   :  { %v526_v30 = vmul.f32 0.5, %v525_v23  ;;  %v1231_v31 = vadd.f32 1e-05, %v488_v24  ;;  %708 = vmatpush.msra.mxu3 %v611_v37  ;;  %v655_v37 = vld [vmem:[#allocation7 + $0x1f8] sm:$0xff] }
  0xbf   :  { %726 = vmatpush.msrb.mxu0 %v629_v22  ;;  %v411_v32 = vadd.f32 %v410_v27, %v1226_v25  ;;  %v444_v33 = vrot.slane %v435_v28, 4  ;;  %736 = vmatpush.msrb.mxu1 %v655_v37 }
  0xc0   :  { %v527_v35 = vsub.f32 1.5, %v526_v30  ;;  %854 = vrsqrt.f32 %v1231_v31  ;;  %709 = vmatpush.msra.mxu3 %v610_v45  ;;  %vm509_vm7 = vweird.f32 %v1231_v31  ;;  %v648_v45 = vld [vmem:[#allocation7 + $0x1c0] sm:$0xff] }
  0xc1   :  { %727 = vmatpush.msrb.mxu0 %v628_v29  ;;  %v412_v38 = vrot.slane %v411_v32, 2  ;;  %v445_v39 = vadd.f32 %v444_v33, %v435_v28  ;;  %v578_v33 = vperm.slane %v1244_v42, 1 }
  0xc2   :  { %v528_v41 = vmul.f32 %v853_v10, %v527_v35  ;;  %710 = vmatpush.msra.mxu3 %v609_v52  ;;  %v646_v52 = vld [vmem:[#allocation7 + $0x1b0] sm:$0xff] }
  0xc3   :  { %728 = vmatpush.msrb.mxu0 %v627_v34  ;;  %v413_v46 = vadd.f32 %v412_v38, %v411_v32  ;;  %v446_v47 = vrot.slane %v445_v39, 2  ;;  %v654_v38 = vld [vmem:[#allocation7 + $0x1f0] sm:$0xff] }
  0xc4   :  { %v532_v50 = vsel %vm531_vm5, %v853_v10, %v528_v41  ;;  %711 = vmatpush.msra.mxu3 %v608_v60  ;;  %737 = vmatpush.msrb.mxu1 %v654_v38  ;;  %v662_v38 = vld [vmem:[#allocation7 + $0x230] sm:$0xff] }
  0xc5   :  { %729 = vmatpush.msrb.mxu0 %v626_v40  ;;  %v555_v48 = vmul.f32 %v532_v50, %v495_v43  ;;  %v414_v55 = vrot.slane %v413_v46, 1  ;;  %v447_v56 = vadd.f32 %v446_v47, %v445_v39  ;;  %v653_v39 = vld [vmem:[#allocation7 + $0x1e8] sm:$0xff]  ;;  %v652_v40 = vld [vmem:[#allocation7 + $0x1e0] sm:$0xff]  ;;  %v650_v43 = vld [vmem:[#allocation7 + $0x1d0] sm:$0xff] }
  0xc6   :  { %v855_v57 = vpop.eup %854  ;;  %738 = vmatpush.msrb.mxu1 %v653_v39  ;;  %v647_v50 = vld [vmem:[#allocation7 + $0x1b8] sm:$0xff] }
  0xc7   :  { %730 = vmatpush.msrb.mxu0 %v625_v49  ;;  %v572_v21 = vmul.f32 %v562_v44, %v555_v48  ;;  %v504_v59 = vmul.f32 %v855_v57, %v1231_v31  ;;  %v415_v61 = vadd.f32 %v414_v55, %v413_v46  ;;  %v448_v62 = vrot.slane %v447_v56, 1  ;;  %v649_v44 = vld [vmem:[#allocation7 + $0x1c8] sm:$0xff] }
  0xc8   :  { %vm510_vm6 = vweird.f32 %v855_v57  ;;  %v561_v31 = vperm.slane %v1237_v36, 1  ;;  %739 = vmatpush.msrb.mxu1 %v652_v40 }
  0xc9   :  { %731 = vmatpush.msrb.mxu0 %v624_v58  ;;  %v589_v63 = vadd.f32 %v579_v51, %v572_v21  ;;  %v505_v0 = vmul.f32 %v855_v57, %v504_v59  ;;  %v469_v2 = vmul.f32 0.25, %v415_v61  ;;  %v449_v3 = vadd.f32 %v448_v62, %v447_v56  ;;  %vm511_vm8 = vmor %vm509_vm7, %vm510_vm6  ;;  %v645_v21 = vld [vmem:[#allocation7 + $0x1a8] sm:$0xff]  ;;  %v671_v59 = vld [vmem:[#allocation7 + $0x278] sm:$0xff] }
  0xca   :  { %756 = vmatpush.msrb.mxu2 %v671_v59 }
  0xcb   :  { %732 = vmatmul.f32.vlgmr.msrb.gmra.mxu0 %v589_v63  ;;  %v506_v5 = vmul.f32 0.5, %v505_v0  ;;  %v479_v6 = vmul.f32 %v469_v2, %v469_v2  ;;  %v474_v8 = vmul.f32 0.25, %v449_v3  ;;  %v494_v30 = vsub.f32 %v1226_v25, %v469_v2  ;;  %v651_v25 = vld [vmem:[#allocation7 + $0x1d8] sm:$0xff]  ;;  %v644_v63 = vld [vmem:[#allocation7 + $0x1a0] sm:$0xff]  ;;  %v670_v0 = vld [vmem:[#allocation7 + $0x270] sm:$0xff] }
  0xcc   :  { %740 = vmatpush.msrb.mxu1 %v651_v25  ;;  %757 = vmatpush.msrb.mxu2 %v670_v0  ;;  %v661_v25 = vld [vmem:[#allocation7 + $0x228] sm:$0xff] }
  0xcd   :  { %v507_v9 = vsub.f32 1.5, %v506_v5  ;;  %v484_v10 = vsub.f32 %v474_v8, %v479_v6  ;;  %v643_v6 = vld [vmem:[#allocation7 + $0x198] sm:$0xff]  ;;  %v669_v8 = vld [vmem:[#allocation7 + $0x268] sm:$0xff] }
  0xce   :  { %741 = vmatpush.msrb.mxu1 %v650_v43  ;;  %758 = vmatpush.msrb.mxu2 %v669_v8 }
  0xcf   :  { %v508_v11 = vmul.f32 %v855_v57, %v507_v9  ;;  %v489_v15 = vmax.f32 %v484_v10, 0.0 }
  0xd0   :  { %742 = vmatpush.msrb.mxu1 %v649_v44 }
  0xd1   :  { %v512_v16 = vsel %vm511_vm8, %v855_v57, %v508_v11  ;;  %v499_v20 = vadd.f32 1e-05, %v489_v15  ;;  %v668_v15 = vld [vmem:[#allocation7 + $0x260] sm:$0xff] }
  0xd2   :  { %v553_v18 = vmul.f32 %v512_v16, %v493_v12  ;;  %743 = vmatpush.msrb.mxu1 %v648_v45  ;;  %759 = vmatpush.msrb.mxu2 %v668_v15  ;;  %v660_v45 = vld [vmem:[#allocation7 + $0x220] sm:$0xff] }
  0xd3   :  { %856 = vrsqrt.f32 %v499_v20  ;;  %vm519_vm10 = vweird.f32 %v499_v20 }
  0xd4   :  { %v570_v22 = vmul.f32 %v560_v14, %v553_v18  ;;  %744 = vmatpush.msrb.mxu1 %v647_v50  ;;  %v642_v14 = vld [vmem:[#allocation7 + $0x190] sm:$0xff]  ;;  %v641_v18 = vld [vmem:[#allocation7 + $0x188] sm:$0xff] }
  0xd6   :  { %v587_v23 = vadd.f32 %v577_v19, %v570_v22  ;;  %745 = vmatpush.msrb.mxu1 %v646_v52  ;;  %v667_v19 = vld [vmem:[#allocation7 + $0x258] sm:$0xff] }
  0xd7   :  { %760 = vmatpush.msrb.mxu2 %v667_v19 }
  0xd8   :  { %692 = vmatmul.f32.vlgmr.msra.gmra.mxu2 %v587_v23  ;;  %746 = vmatpush.msrb.mxu1 %v645_v21  ;;  %v666_v23 = vld [vmem:[#allocation7 + $0x250] sm:$0xff] }
  0xd9   :  { %v857_v24 = vpop.eup %856  ;;  %761 = vmatpush.msrb.mxu2 %v666_v23  ;;  %v564_v23 = vperm.slane %v1237_v36, 4 }
  0xda   :  { %v514_v26 = vmul.f32 %v857_v24, %v499_v20  ;;  %vm520_vm9 = vweird.f32 %v857_v24  ;;  %747 = vmatpush.msrb.mxu1 %v644_v63 }
  0xdb   :  { %vm521_vm11 = vmor %vm519_vm10, %vm520_vm9 }
  0xdc   :  { %v515_v27 = vmul.f32 %v857_v24, %v514_v26  ;;  %748 = vmatpush.msrb.mxu1 %v643_v6 }
  0xde   :  { %v516_v28 = vmul.f32 0.5, %v515_v27  ;;  %749 = vmatpush.msrb.mxu1 %v642_v14  ;;  %v580_v14 = vperm.slane %v1244_v42, 3 }
  0xe0   :  { %v517_v29 = vsub.f32 1.5, %v516_v28  ;;  %750 = vmatpush.msrb.mxu1 %v641_v18 }
  0xe2   :  { %v518_v1 = vmul.f32 %v857_v24, %v517_v29  ;;  %v665_v29 = vld [vmem:[#allocation7 + $0x248] sm:$0xff] }
  0xe3   :  { %762 = vmatpush.msrb.mxu2 %v665_v29 }
  0xe4   :  { %v522_v13 = vsel %vm521_vm11, %v857_v24, %v518_v1 }
  0xe5   :  { %v554_v32 = vmul.f32 %v522_v13, %v494_v30  ;;  %v664_v13 = vld [vmem:[#allocation7 + $0x240] sm:$0xff] }
  0xe6   :  { %763 = vmatpush.msrb.mxu2 %v664_v13  ;;  %v789_v13 = vld [vmem:[#allocation9 + $0x60] sm:$0xff] }
  0xe7   :  { %v571_v34 = vmul.f32 %v561_v31, %v554_v32 }
  0xe9   :  { %v588_v35 = vadd.f32 %v578_v33, %v571_v34 }
  0xeb   :  { %712 = vmatmul.f32.vlgmr.msra.gmra.mxu3 %v588_v35  ;;  %v663_v35 = vld [vmem:[#allocation7 + $0x238] sm:$0xff] }
  0xec   :  { %764 = vmatpush.msrb.mxu2 %v663_v35  ;;  %v784_v35 = vld [vmem:[#allocation9 + $0x38] sm:$0xff] }
  0xee   :  { %765 = vmatpush.msrb.mxu2 %v662_v38  ;;  %v780_v38 = vld [vmem:[#allocation9 + $0x18] sm:$0xff] }
  0xf0   :  { %766 = vmatpush.msrb.mxu2 %v661_v25 }
  0xf2   :  { %767 = vmatpush.msrb.mxu2 %v660_v45 }
 0x11a   :  { %v290_v41 = vpop.f32.mrf.mxu1 }
 0x11b   :  { %v395_v9 = vmul.f32 %v290_v41, %v1175_v53 }
 0x120   :  { %v310_v55 = vpop.f32.mrf.mxu2 }
 0x121   :  { %v396_v2 = vmul.f32 %v310_v55, %v1177_v54  ;;  %v847_v54 = vld [vmem:[%s1304_s4] ss:$0 sm:$0xff] }
 0x122   :  { %v1260_v46 = vpop.f32.mrf.mxu1  ;;  %v393_v1 = vmul.f32 %v847_v54, %v1200_v17 }
 0x123   :  { %v422_v47 = vrot.slane %v1260_v46, 4  ;;  %v436_v49 = vmul.f32 %v1260_v46, %v1260_v46  ;;  %v397_v16 = vsub.f32 %v395_v9, %v396_v2  ;;  %v563_v9 = vperm.slane %v1237_v36, 3  ;;  %v785_v36 = vld [vmem:[#allocation9 + $0x40] sm:$0xff] }
 0x125   :  { %v423_v48 = vadd.f32 %v422_v47, %v1260_v46  ;;  %v456_v51 = vrot.slane %v436_v49, 4  ;;  %v659_v47 = vld [vmem:[#allocation7 + $0x218] sm:$0xff] }
 0x126   :  { %768 = vmatpush.msrb.mxu2 %v659_v47 }
 0x127   :  { %v424_v56 = vrot.slane %v423_v48, 2  ;;  %v457_v57 = vadd.f32 %v456_v51, %v436_v49  ;;  %v270_v58 = vpop.f32.mrf.mxu0  ;;  %v330_v62 = vpop.f32.mrf.mxu3  ;;  %v658_v51 = vld [vmem:[#allocation7 + $0x210] sm:$0xff] }
 0x128   :  { %v398_v10 = vmul.f32 %v330_v62, %v1187_v4  ;;  %v640_v4 = vld [vmem:[#allocation7 + $0x180] sm:$0xff]  ;;  %v394_v32 = vadd.f32 %v393_v1, %v270_v58  ;;  %769 = vmatpush.msrb.mxu2 %v658_v51  ;;  %v792_v1 = vld [vmem:[#allocation9 + $0x78] sm:$0xff] }
 0x129   :  { %v425_v60 = vadd.f32 %v424_v56, %v423_v48  ;;  %v458_v61 = vrot.slane %v457_v57, 2  ;;  %751 = vmatpush.msrb.mxu1 %v640_v4  ;;  %797 = vmatpush.msrb.mxu3 %v792_v1 }
 0x12a   :  { %v399_v24 = vsub.f32 %v397_v16, %v398_v10 }
 0x12b   :  { %v426_v3 = vrot.slane %v425_v60, 1  ;;  %v459_v5 = vadd.f32 %v458_v61, %v457_v57  ;;  %v657_v57 = vld [vmem:[#allocation7 + $0x208] sm:$0xff] }
 0x12c   :  { %770 = vmatpush.msrb.mxu2 %v657_v57 }
 0x12d   :  { %v427_v11 = vadd.f32 %v426_v3, %v425_v60  ;;  %v460_v12 = vrot.slane %v459_v5, 1  ;;  %v656_v60 = vld [vmem:[#allocation7 + $0x200] sm:$0xff] }
 0x12e   :  { %771 = vmatpush.msrb.mxu2 %v656_v60 }
 0x12f   :  { %v461_v20 = vadd.f32 %v460_v12, %v459_v5  ;;  %v1272_v22 = vmul.f32 0.25, %v427_v11  ;;  %v350_v53 = vpop.f32.mrf.mxu0 }
 0x130   :  { %v400_v26 = vmul.f32 %v350_v53, %v1192_v7 }
 0x131   :  { %v476_v27 = vmul.f32 0.25, %v461_v20  ;;  %v481_v28 = vmul.f32 %v1272_v22, %v1272_v22  ;;  %v496_v8 = vsub.f32 %v1260_v46, %v1272_v22 }
 0x132   :  { %v401_v30 = vsub.f32 %v399_v24, %v400_v26 }
 0x133   :  { %v486_v31 = vsub.f32 %v476_v27, %v481_v28  ;;  %v581_v27 = vperm.slane %v1244_v42, 4  ;;  %v783_v42 = vld [vmem:[#allocation9 + $0x30] sm:$0xff] }
 0x134   :  { %v402_v33 = vmul.f32 2.0, %v401_v30  ;;  %v791_v30 = vld [vmem:[#allocation9 + $0x70] sm:$0xff] }
 0x135   :  { %v491_v34 = vmax.f32 %v486_v31, 0.0  ;;  %v790_v31 = vld [vmem:[#allocation9 + $0x68] sm:$0xff]  ;;  %798 = vmatpush.msrb.mxu3 %v791_v30 }
 0x136   :  { %v1278_v7 = vsub.f32 %v394_v32, %v402_v33  ;;  %v788_v32 = vld [vmem:[#allocation9 + $0x58] sm:$0xff]  ;;  %v787_v33 = vld [vmem:[#allocation9 + $0x50] sm:$0xff] }
 0x137   :  { %v501_v37 = vadd.f32 1e-05, %v491_v34  ;;  %799 = vmatpush.msrb.mxu3 %v790_v31  ;;  %v786_v34 = vld [vmem:[#allocation9 + $0x48] sm:$0xff] }
 0x138   :  { %v428_v39 = vrot.slane %v1278_v7, 4  ;;  %v437_v17 = vmul.f32 %v1278_v7, %v1278_v7 }
 0x139   :  { %858 = vrsqrt.f32 %v501_v37  ;;  %vm539_vm13 = vweird.f32 %v501_v37  ;;  %800 = vmatpush.msrb.mxu3 %v789_v13 }
 0x13a   :  { %v429_v40 = vadd.f32 %v428_v39, %v1278_v7  ;;  %v462_v41 = vrot.slane %v437_v17, 4  ;;  %v779_v39 = vld [vmem:[#allocation9 + $0x10] sm:$0xff] }
 0x13b   :  { %801 = vmatpush.msrb.mxu3 %v788_v32 }
 0x13c   :  { %v430_v43 = vrot.slane %v429_v40, 2  ;;  %v463_v44 = vadd.f32 %v462_v41, %v437_v17  ;;  %v778_v17 = vld [vmem:[#allocation9 + $0x8] sm:$0xff]  ;;  %v848_v41 = vld [vmem:[%s1308_s8] ss:$0 sm:$0xff] }
 0x13d   :  { %802 = vmatpush.msrb.mxu3 %v787_v33 }
 0x13e   :  { %v431_v49 = vadd.f32 %v430_v43, %v429_v40  ;;  %v464_v50 = vrot.slane %v463_v44, 2  ;;  %v777_v40 = vld [vmem:[#allocation9] sm:$0xff] }
 0x13f   :  { %v859_v48 = vpop.eup %858  ;;  %803 = vmatpush.msrb.mxu3 %v786_v34 }
 0x140   :  { %v534_v52 = vmul.f32 %v859_v48, %v501_v37  ;;  %v432_v55 = vrot.slane %v431_v49, 1  ;;  %v465_v56 = vadd.f32 %v464_v50, %v463_v44  ;;  %vm540_vm12 = vweird.f32 %v859_v48  ;;  %v781_v37 = vld [vmem:[#allocation9 + $0x20] sm:$0xff] }
 0x141   :  { %vm541_vm14 = vmor %vm539_vm13, %vm540_vm12  ;;  %804 = vmatpush.msrb.mxu3 %v785_v36 }
 0x142   :  { %v535_v58 = vmul.f32 %v859_v48, %v534_v52  ;;  %v433_v21 = vadd.f32 %v432_v55, %v431_v49  ;;  %v466_v59 = vrot.slane %v465_v56, 1 }
 0x143   :  { %805 = vmatpush.msrb.mxu3 %v784_v35 }
 0x144   :  { %v536_v61 = vmul.f32 0.5, %v535_v58  ;;  %v467_v62 = vadd.f32 %v466_v59, %v465_v56  ;;  %v472_v63 = vmul.f32 0.25, %v433_v21  ;;  %v849_v56 = vld [vmem:[%s1310_s10] ss:$0 sm:$0xff] }
 0x145   :  { %806 = vmatpush.msrb.mxu3 %v783_v42 }
 0x146   :  { %v537_v0 = vsub.f32 1.5, %v536_v61  ;;  %v477_v2 = vmul.f32 0.25, %v467_v62  ;;  %v482_v3 = vmul.f32 %v472_v63, %v472_v63  ;;  %v497_v22 = vsub.f32 %v1278_v7, %v472_v63  ;;  %v782_v7 = vld [vmem:[#allocation9 + $0x28] sm:$0xff] }
 0x147   :  { %807 = vmatpush.msrb.mxu3 %v782_v7 }
 0x148   :  { %v538_v5 = vmul.f32 %v859_v48, %v537_v0  ;;  %v487_v6 = vsub.f32 %v477_v2, %v482_v3  ;;  %v733_v47 = vpop.f32.mrf.mxu0 }
 0x149   :  { %808 = vmatpush.msrb.mxu3 %v781_v37 }
 0x14a   :  { %v542_v10 = vsel %vm541_vm14, %v859_v48, %v538_v5  ;;  %v492_v11 = vmax.f32 %v487_v6, 0.0 }
 0x14b   :  { %v556_v12 = vmul.f32 %v542_v10, %v496_v8  ;;  %809 = vmatpush.msrb.mxu3 %v780_v38 }
 0x14c   :  { %v502_v15 = vadd.f32 1e-05, %v492_v11 }
 0x14d   :  { %v573_v16 = vmul.f32 %v563_v9, %v556_v12  ;;  %810 = vmatpush.msrb.mxu3 %v779_v39 }
 0x14e   :  { %860 = vrsqrt.f32 %v502_v15  ;;  %vm549_vm0 = vweird.f32 %v502_v15 }
 0x14f   :  { %v590_v54 = vadd.f32 %v580_v14, %v573_v16  ;;  %811 = vmatpush.msrb.mxu3 %v778_v17 }
 0x151   :  { %752 = vmatmul.f32.vlgmr.msrb.gmra.mxu1 %v590_v54  ;;  %812 = vmatpush.msrb.mxu3 %v777_v40 }
 0x154   :  { %v861_v18 = vpop.eup %860 }
 0x155   :  { %v544_v19 = vmul.f32 %v861_v18, %v502_v15  ;;  %vm550_vm15 = vweird.f32 %v861_v18 }
 0x156   :  { %vm551_vm1 = vmor %vm549_vm0, %vm550_vm15 }
 0x157   :  { %v545_v20 = vmul.f32 %v861_v18, %v544_v19 }
 0x159   :  { %v546_v53 = vmul.f32 0.5, %v545_v20 }
 0x15b   :  { %v547_v4 = vsub.f32 1.5, %v546_v53  ;;  %v693_v25 = vpop.f32.mrf.mxu2 }
 0x15c   :  { %v694_v44 = vadd.f32 %v848_v41, %v693_v25 }
 0x15d   :  { %v548_v46 = vmul.f32 %v861_v18, %v547_v4 }
 0x15f   :  { %v552_v24 = vsel %vm551_vm1, %v861_v18, %v548_v46 }
 0x160   :  { %v557_v26 = vmul.f32 %v552_v24, %v497_v22 }
 0x162   :  { %v574_v28 = vmul.f32 %v564_v23, %v557_v26 }
 0x164   :  { %v591_v29 = vadd.f32 %v581_v27, %v574_v28 }
 0x166   :  { %772 = vmatmul.f32.vlgmr.msrb.gmra.mxu2 %v591_v29 }
 0x16e   :  { %v713_v43 = vpop.f32.mrf.mxu3 }
 0x16f   :  { %v714_v45 = vadd.f32 %v713_v43, %v694_v44 }
 0x171   :  { %v734_v50 = vadd.f32 %v733_v47, %v714_v45 }
 0x1ce   :  { %v753_v49 = vpop.f32.mrf.mxu1 }
 0x1cf   :  { %v754_v48 = vadd.f32 %v753_v49, %v734_v50 }
 0x1e9   :  { %v773_v51 = vpop.f32.mrf.mxu2 }
 0x1ea   :  { %v774_v52 = vadd.f32 %v773_v51, %v754_v48 }
 0x1ec   :  { %v776_v55 = vmax.f32 %v774_v52, 0.0 }
 0x1ee   :  { %813 = vmatmul.f32.vlgmr.msrb.gmra.mxu3 %v776_v55 }
 0x271   :  { %v814_v57 = vpop.f32.mrf.mxu3 }
 0x272   :  { %v815_v58 = vadd.f32 %v849_v56, %v814_v57 }
 0x274   :  { %v817_v21 = vand.u32 2147483647, %v815_v58  ;;  %vm823_vm2 = vcmp.ge.f32.partialorder %v815_v58, 0.0 }
 0x276   :  { %v818_v59 = vsub.f32 0.0, %v817_v21 }
 0x278   :  { %v819_v60 = vmul.f32 1.442695, %v818_v59 }
 0x27a   :  { %862 = vpow2.f32 %v819_v60 }
 0x280   :  { %v863_v61 = vpop.eup %862 }
 0x281   :  { %v821_v62 = vadd.f32 1.0, %v863_v61 }
 0x283   :  { %864 = vrcp.f32 %v821_v62 }
 0x289   :  { %v865_v63 = vpop.eup %864 }
 0x28a   :  { %v824_v0 = vsub.f32 1.0, %v865_v63 }
 0x28c   :  { %v825_v2 = vsel %vm823_vm2, %v865_v63, %v824_v0 }
 0x28d   :  { %826 = vst [vmem:[%s1311_s11] sm:$0xff] %v825_v2 }
 0x28e   :  { %831 = vsyncpa [#allocation3], 1 }
 0x28f   :  { %832 = vsyncpa [#allocation5], 1 }
 0x290   :  { %833 = vsyncpa [#allocation8], 1 }

// kernel: _lambda_.3
= control target key start
LH: loop header
LB: loop body
LE: loop exit
PB: predicated region body
PF: predicated region fallthrough
CT: control target
= control target key end

     0   :  { %16 = vsyncpa [#allocation3], 0  ;;  %s1480_s0 = inlined_call_operand.vmem [shape: f32[8,24], index: 0, kind: input, shape index: {}]   ;;  %s1481_s1 = inlined_call_operand.hbm [shape: f32[24,512], index: 1, kind: input, shape index: {}]   ;;  %s1482_s2 = inlined_call_operand.hbm [shape: f32[128,128], index: 2, kind: input, shape index: {}]   ;;  %s1483_s3 = inlined_call_operand.hbm [shape: f32[128,128], index: 3, kind: input, shape index: {}]   ;;  %s1484_s4 = inlined_call_operand.vmem [shape: f32[1,128], index: 4, kind: input, shape index: {}]   ;;  %s1485_s5 = inlined_call_operand.vmem [shape: f32[1,640], index: 5, kind: input, shape index: {}]   ;;  %s1486_s6 = inlined_call_operand.vmem [shape: f32[1,640], index: 6, kind: input, shape index: {}]   ;;  %s1487_s7 = inlined_call_operand.vmem [shape: f32[640,128], index: 7, kind: input, shape index: {}]   ;;  %s1488_s8 = inlined_call_operand.vmem [shape: f32[1,128], index: 8, kind: input, shape index: {}, may-alias: {8,10}]   ;;  %s1489_s9 = inlined_call_operand.hbm [shape: f32[128,128], index: 9, kind: input, shape index: {}]   ;;  %s1490_s10 = inlined_call_operand.vmem [shape: f32[1,128], index: 10, kind: input, shape index: {}, may-alias: {8,10}]   ;;  %s1491_s11 = inlined_call_operand.vmem [shape: f32[8,128], index: 11, kind: output, shape index: {}]  }
   0x1   :  { %17 = vsyncpa [#allocation5], 0  ;;  %s38_s19 = sshll.u32 %s1482_s2, 4  ;;  %s39_s19 = int_to_ptr.hbm [resolvable:$true] %s38_s19 }
   0x2   :  { %18 = vsyncpa [#allocation8], 0  ;;  %s948_s20 = smov [#allocation4]   ;;  %s25_s24 = sshll.u32 %s1481_s1, 4  ;;  %s26_s24 = int_to_ptr.hbm [resolvable:$true] %s25_s24 }
   0x3   :  { %s40_s21 = sshll.u32 %s948_s20, 4  ;;  %s949_s25 = smov 128   ;;  %s41_s21 = int_to_ptr.vmem [resolvable:$true] %s40_s21 }
   0x4   :  { %s950_s26 = smov 8   ;;  %s951_s27 = smov [#allocation2]  }
   0x5   :  { %46 = dma.hbm_to_vmem [thread:$0]  %s39_s19, 2048, %s41_s21, [#allocation5], %s949_s25, %s949_s25, %s950_s26  }
   0x6   :  { %s27_s28 = sshll.u32 %s951_s27, 4  ;;  %s952_s29 = smov 512   ;;  %s28_s28 = int_to_ptr.vmem [resolvable:$true] %s27_s28 }
   0x7   :  { %s953_s30 = smov 32   ;;  %s51_s13 = sshll.u32 %s1483_s3, 4  ;;  %s52_s13 = int_to_ptr.hbm [resolvable:$true] %s51_s13 }
   0x8   :  { %33 = dma.hbm_to_vmem [thread:$0]  %s26_s24, 1536, %s28_s28, [#allocation3], %s952_s29, %s952_s29, %s953_s30  }
   0x9   :  { %s954_s14 = smov [#allocation6]   ;;  %s74_s17 = sshll.u32 %s1489_s9, 4  ;;  %s75_s17 = int_to_ptr.hbm [resolvable:$true] %s74_s17 }
   0xa   :  { %s53_s15 = sshll.u32 %s954_s14, 4  ;;  %s955_s18 = smov [#allocation7]   ;;  %s54_s15 = int_to_ptr.vmem [resolvable:$true] %s53_s15 }
   0xb   :  { %59 = dma.hbm_to_vmem [thread:$0]  %s52_s13, 2048, %s54_s15, [#allocation5], %s949_s25, %s949_s25, %s950_s26  }
   0xc   :  { %s76_s19 = sshll.u32 %s955_s18, 4  ;;  %s77_s19 = int_to_ptr.vmem [resolvable:$true] %s76_s19 }
   0xd   :  { %82 = dma.hbm_to_vmem [thread:$0]  %s75_s17, 2048, %s77_s19, [#allocation8], %s949_s25, %s949_s25, %s950_s26  }
   0xe   :  { %942 = dma.done.wait [#allocation3], 1536  }
   0xf   :  { %943 = vsyncadd [#allocation3], 4294965760 }
  0x10   :  { %944 = dma.done.wait [#allocation5], 4096  }
  0x11   :  { %945 = vsyncadd [#allocation5], 4294963200 }
  0x12   :  { %946 = dma.done.wait [#allocation8], 2048  }
  0x13   :  { %947 = vsyncadd [#allocation8], 4294965248  ;;  %v110_v0 = vld [vmem:[#allocation2 + $0x40] sm:$0xff]  ;;  %v111_v1 = vld [vmem:[#allocation2 + $0x48] sm:$0xff]  ;;  %vm114_vm0 = vcmask 195584  }
  0x14   :  { %v112_v2 = vld [vmem:[#allocation2 + $0x50] sm:$0xff]  ;;  %131 = vmatpush.msra.mxu0 %v110_v0  ;;  %151 = vmatpush.msra.mxu1 %v111_v1  ;;  %v106_v3 = vld [vmem:[#allocation2 + $0x20] sm:$0xff]  ;;  %v107_v4 = vld [vmem:[#allocation2 + $0x28] sm:$0xff] }
  0x15   :  { %v108_v5 = vld [vmem:[#allocation2 + $0x30] sm:$0xff]  ;;  %171 = vmatpush.msra.mxu2 %v112_v2  ;;  %v113_v6 = vld [vmem:[#allocation2 + $0x58] sm:$0xff]  ;;  %v102_v7 = vld [vmem:[#allocation2] sm:$0xff] }
  0x16   :  { %v103_v8 = vld [vmem:[#allocation2 + $0x8] sm:$0xff]  ;;  %132 = vmatpush.msra.mxu0 %v106_v3  ;;  %152 = vmatpush.msra.mxu1 %v107_v4  ;;  %v104_v9 = vld [vmem:[#allocation2 + $0x10] sm:$0xff]  ;;  %v109_v10 = vld [vmem:[#allocation2 + $0x38] sm:$0xff] }
  0x17   :  { %172 = vmatpush.msra.mxu2 %v108_v5  ;;  %191 = vmatpush.msra.mxu3 %v113_v6  ;;  %v101_v11 = vld [vmem:[%s1480_s0] sm:$0xff]  ;;  %v105_v12 = vld [vmem:[#allocation2 + $0x18] sm:$0xff]  ;;  %v1033_v14 = vld [vmem:[#allocation4 + $0x70] sm:$0xff] }
  0x18   :  { %133 = vmatpush.msra.mxu0 %v102_v7  ;;  %153 = vmatpush.msra.mxu1 %v103_v8  ;;  %v1031_v13 = vld [vmem:[#allocation4 + $0x78] sm:$0xff]  ;;  %v1036_v15 = vld [vmem:[#allocation4 + $0x68] sm:$0xff]  ;;  %v1042_v16 = vld [vmem:[#allocation4 + $0x60] sm:$0xff] }
  0x19   :  { %173 = vmatpush.msra.mxu2 %v104_v9  ;;  %192 = vmatpush.msra.mxu3 %v109_v10  ;;  %v1048_v17 = vld [vmem:[#allocation4 + $0x58] sm:$0xff]  ;;  %v1054_v18 = vld [vmem:[#allocation4 + $0x50] sm:$0xff]  ;;  %v1060_v19 = vld [vmem:[#allocation4 + $0x48] sm:$0xff] }
  0x1a   :  { %815 = vmatmul.msk.f32.vlgmr.msra.gmra.mxu0 %vm114_vm0, %v101_v11  ;;  %816 = vmatmul.msk.f32.vlgmr.msra.gmra.mxu1 %vm114_vm0, %v101_v11  ;;  %v1066_v20 = vld [vmem:[#allocation4 + $0x40] sm:$0xff]  ;;  %v1072_v21 = vld [vmem:[#allocation4 + $0x38] sm:$0xff]  ;;  %v1078_v22 = vld [vmem:[#allocation4 + $0x30] sm:$0xff] }
  0x1b   :  { %817 = vmatmul.msk.f32.vlgmr.msra.gmra.mxu2 %vm114_vm0, %v101_v11  ;;  %193 = vmatpush.msra.mxu3 %v105_v12  ;;  %v1084_v23 = vld [vmem:[#allocation4 + $0x28] sm:$0xff]  ;;  %v1090_v24 = vld [vmem:[#allocation4 + $0x20] sm:$0xff]  ;;  %v221_v25 = vld [vmem:[#allocation4 + $0x18] sm:$0xff] }
  0x1c   :  { %818 = vmatmul.msk.f32.vlgmr.msra.gmra.mxu3 %vm114_vm0, %v101_v11  ;;  %254 = vmatpush.msrb.mxu1 %v1031_v13  ;;  %v220_v26 = vld [vmem:[#allocation4 + $0x10] sm:$0xff]  ;;  %v219_v27 = vld [vmem:[#allocation4 + $0x8] sm:$0xff]  ;;  %v218_v28 = vld [vmem:[#allocation4] sm:$0xff] }
  0x1d   :  { %234 = vmatpush.msrb.mxu0 %v1031_v13  ;;  %274 = vmatpush.msrb.mxu2 %v1031_v13  ;;  %v349_v29 = vld [vmem:[#allocation6 + $0x78] sm:$0xff]  ;;  %v348_v30 = vld [vmem:[#allocation6 + $0x70] sm:$0xff]  ;;  %v347_v31 = vld [vmem:[#allocation6 + $0x68] sm:$0xff] }
  0x1e   :  { %255 = vmatpush.msrb.mxu1 %v1033_v14  ;;  %294 = vmatpush.msrb.mxu3 %v1031_v13  ;;  %v346_v32 = vld [vmem:[#allocation6 + $0x60] sm:$0xff]  ;;  %v345_v33 = vld [vmem:[#allocation6 + $0x58] sm:$0xff]  ;;  %v344_v34 = vld [vmem:[#allocation6 + $0x50] sm:$0xff] }
  0x1f   :  { %235 = vmatpush.msrb.mxu0 %v1033_v14  ;;  %275 = vmatpush.msrb.mxu2 %v1033_v14  ;;  %v343_v35 = vld [vmem:[#allocation6 + $0x48] sm:$0xff]  ;;  %v342_v36 = vld [vmem:[#allocation6 + $0x40] sm:$0xff]  ;;  %v341_v37 = vld [vmem:[#allocation6 + $0x38] sm:$0xff] }
  0x20   :  { %256 = vmatpush.msrb.mxu1 %v1036_v15  ;;  %295 = vmatpush.msrb.mxu3 %v1033_v14  ;;  %v340_v38 = vld [vmem:[#allocation6 + $0x30] sm:$0xff]  ;;  %v339_v39 = vld [vmem:[#allocation6 + $0x28] sm:$0xff]  ;;  %v338_v40 = vld [vmem:[#allocation6 + $0x20] sm:$0xff] }
  0x21   :  { %236 = vmatpush.msrb.mxu0 %v1036_v15  ;;  %276 = vmatpush.msrb.mxu2 %v1036_v15  ;;  %v337_v41 = vld [vmem:[#allocation6 + $0x18] sm:$0xff]  ;;  %v336_v42 = vld [vmem:[#allocation6 + $0x10] sm:$0xff]  ;;  %v335_v43 = vld [vmem:[#allocation6 + $0x8] sm:$0xff] }
  0x22   :  { %257 = vmatpush.msrb.mxu1 %v1042_v16  ;;  %296 = vmatpush.msrb.mxu3 %v1036_v15  ;;  %v334_v44 = vld [vmem:[#allocation6] sm:$0xff]  ;;  %v588_v45 = vld [vmem:[%s1487_s7 + $0x78] sm:$0xff]  ;;  %v587_v46 = vld [vmem:[%s1487_s7 + $0x70] sm:$0xff] }
  0x23   :  { %237 = vmatpush.msrb.mxu0 %v1042_v16  ;;  %277 = vmatpush.msrb.mxu2 %v1042_v16  ;;  %v586_v47 = vld [vmem:[%s1487_s7 + $0x68] sm:$0xff]  ;;  %v585_v48 = vld [vmem:[%s1487_s7 + $0x60] sm:$0xff]  ;;  %v584_v53 = vld [vmem:[%s1487_s7 + $0x58] sm:$0xff] }
  0x24   :  { %258 = vmatpush.msrb.mxu1 %v1048_v17  ;;  %297 = vmatpush.msrb.mxu3 %v1042_v16  ;;  %v583_v57 = vld [vmem:[%s1487_s7 + $0x50] sm:$0xff]  ;;  %v582_v60 = vld [vmem:[%s1487_s7 + $0x48] sm:$0xff]  ;;  %v581_v1 = vld [vmem:[%s1487_s7 + $0x40] sm:$0xff] }
  0x25   :  { %238 = vmatpush.msrb.mxu0 %v1048_v17  ;;  %278 = vmatpush.msrb.mxu2 %v1048_v17  ;;  %v580_v6 = vld [vmem:[%s1487_s7 + $0x38] sm:$0xff]  ;;  %v579_v11 = vld [vmem:[%s1487_s7 + $0x30] sm:$0xff] }
  0x26   :  { %259 = vmatpush.msrb.mxu1 %v1054_v18  ;;  %298 = vmatpush.msrb.mxu3 %v1048_v17 }
  0x27   :  { %239 = vmatpush.msrb.mxu0 %v1054_v18  ;;  %279 = vmatpush.msrb.mxu2 %v1054_v18 }
  0x28   :  { %260 = vmatpush.msrb.mxu1 %v1060_v19  ;;  %299 = vmatpush.msrb.mxu3 %v1054_v18 }
  0x29   :  { %240 = vmatpush.msrb.mxu0 %v1060_v19  ;;  %280 = vmatpush.msrb.mxu2 %v1060_v19 }
  0x2a   :  { %261 = vmatpush.msrb.mxu1 %v1066_v20  ;;  %300 = vmatpush.msrb.mxu3 %v1060_v19 }
  0x2b   :  { %241 = vmatpush.msrb.mxu0 %v1066_v20  ;;  %281 = vmatpush.msrb.mxu2 %v1066_v20 }
  0x2c   :  { %262 = vmatpush.msrb.mxu1 %v1072_v21  ;;  %301 = vmatpush.msrb.mxu3 %v1066_v20 }
  0x2d   :  { %242 = vmatpush.msrb.mxu0 %v1072_v21  ;;  %282 = vmatpush.msrb.mxu2 %v1072_v21 }
  0x2e   :  { %263 = vmatpush.msrb.mxu1 %v1078_v22  ;;  %302 = vmatpush.msrb.mxu3 %v1072_v21 }
  0x2f   :  { %243 = vmatpush.msrb.mxu0 %v1078_v22  ;;  %283 = vmatpush.msrb.mxu2 %v1078_v22 }
  0x30   :  { %264 = vmatpush.msrb.mxu1 %v1084_v23  ;;  %303 = vmatpush.msrb.mxu3 %v1078_v22 }
  0x31   :  { %244 = vmatpush.msrb.mxu0 %v1084_v23  ;;  %284 = vmatpush.msrb.mxu2 %v1084_v23 }
  0x32   :  { %265 = vmatpush.msrb.mxu1 %v1090_v24  ;;  %304 = vmatpush.msrb.mxu3 %v1084_v23 }
  0x33   :  { %245 = vmatpush.msrb.mxu0 %v1090_v24  ;;  %285 = vmatpush.msrb.mxu2 %v1090_v24 }
  0x34   :  { %266 = vmatpush.msrb.mxu1 %v221_v25  ;;  %305 = vmatpush.msrb.mxu3 %v1090_v24 }
  0x35   :  { %246 = vmatpush.msrb.mxu0 %v221_v25  ;;  %286 = vmatpush.msrb.mxu2 %v221_v25 }
  0x36   :  { %267 = vmatpush.msrb.mxu1 %v220_v26  ;;  %306 = vmatpush.msrb.mxu3 %v221_v25 }
  0x37   :  { %247 = vmatpush.msrb.mxu0 %v220_v26  ;;  %287 = vmatpush.msrb.mxu2 %v220_v26 }
  0x38   :  { %268 = vmatpush.msrb.mxu1 %v219_v27  ;;  %307 = vmatpush.msrb.mxu3 %v220_v26 }
  0x39   :  { %248 = vmatpush.msrb.mxu0 %v219_v27  ;;  %288 = vmatpush.msrb.mxu2 %v219_v27 }
  0x3a   :  { %269 = vmatpush.msrb.mxu1 %v218_v28  ;;  %308 = vmatpush.msrb.mxu3 %v219_v27 }
  0x3b   :  { %249 = vmatpush.msrb.mxu0 %v218_v28  ;;  %289 = vmatpush.msrb.mxu2 %v218_v28 }
  0x3c   :  { %350 = vmatpush.msra.mxu1 %v349_v29  ;;  %309 = vmatpush.msrb.mxu3 %v218_v28 }
  0x3d   :  { %314 = vmatpush.msra.mxu0 %v1031_v13  ;;  %657 = vmatpush.msra.mxu2 %v588_v45  ;;  %v574_v45 = vld [vmem:[%s1487_s7 + $0x8] sm:$0xff] }
  0x3e   :  { %351 = vmatpush.msra.mxu1 %v348_v30 }
  0x3f   :  { %315 = vmatpush.msra.mxu0 %v1033_v14  ;;  %658 = vmatpush.msra.mxu2 %v587_v46  ;;  %v620_v14 = vld [vmem:[%s1487_s7 + $0x178] sm:$0xff] }
  0x40   :  { %352 = vmatpush.msra.mxu1 %v347_v31  ;;  %v576_v31 = vld [vmem:[%s1487_s7 + $0x18] sm:$0xff] }
  0x41   :  { %316 = vmatpush.msra.mxu0 %v1036_v15  ;;  %659 = vmatpush.msra.mxu2 %v586_v47  ;;  %v615_v47 = vld [vmem:[%s1487_s7 + $0x150] sm:$0xff] }
  0x42   :  { %353 = vmatpush.msra.mxu1 %v346_v32  ;;  %v601_v32 = vld [vmem:[%s1487_s7 + $0xe0] sm:$0xff] }
  0x43   :  { %317 = vmatpush.msra.mxu0 %v1042_v16  ;;  %660 = vmatpush.msra.mxu2 %v585_v48  ;;  %v604_v16 = vld [vmem:[%s1487_s7 + $0xf8] sm:$0xff]  ;;  %v599_v48 = vld [vmem:[%s1487_s7 + $0xd0] sm:$0xff] }
  0x44   :  { %354 = vmatpush.msra.mxu1 %v345_v33  ;;  %677 = vmatpush.msra.mxu3 %v604_v16 }
  0x45   :  { %318 = vmatpush.msra.mxu0 %v1048_v17  ;;  %661 = vmatpush.msra.mxu2 %v584_v53  ;;  %v573_v53 = vld [vmem:[%s1487_s7] sm:$0xff] }
  0x46   :  { %355 = vmatpush.msra.mxu1 %v344_v34 }
  0x47   :  { %319 = vmatpush.msra.mxu0 %v1054_v18  ;;  %662 = vmatpush.msra.mxu2 %v583_v57 }
  0x48   :  { %356 = vmatpush.msra.mxu1 %v343_v35  ;;  %v617_v35 = vld [vmem:[%s1487_s7 + $0x160] sm:$0xff] }
  0x49   :  { %320 = vmatpush.msra.mxu0 %v1060_v19  ;;  %663 = vmatpush.msra.mxu2 %v582_v60  ;;  %v619_v19 = vld [vmem:[%s1487_s7 + $0x170] sm:$0xff] }
  0x4a   :  { %357 = vmatpush.msra.mxu1 %v342_v36 }
  0x4b   :  { %321 = vmatpush.msra.mxu0 %v1066_v20  ;;  %664 = vmatpush.msra.mxu2 %v581_v1  ;;  %v612_v1 = vld [vmem:[%s1487_s7 + $0x138] sm:$0xff] }
  0x4c   :  { %358 = vmatpush.msra.mxu1 %v341_v37 }
  0x4d   :  { %322 = vmatpush.msra.mxu0 %v1072_v21  ;;  %665 = vmatpush.msra.mxu2 %v580_v6 }
  0x4e   :  { %359 = vmatpush.msra.mxu1 %v340_v38 }
  0x4f   :  { %323 = vmatpush.msra.mxu0 %v1078_v22  ;;  %666 = vmatpush.msra.mxu2 %v579_v11 }
  0x50   :  { %360 = vmatpush.msra.mxu1 %v339_v39  ;;  %v575_v39 = vld [vmem:[%s1487_s7 + $0x10] sm:$0xff] }
  0x51   :  { %324 = vmatpush.msra.mxu0 %v1084_v23  ;;  %v578_v23 = vld [vmem:[%s1487_s7 + $0x28] sm:$0xff] }
  0x52   :  { %361 = vmatpush.msra.mxu1 %v338_v40  ;;  %667 = vmatpush.msra.mxu2 %v578_v23  ;;  %v616_v40 = vld [vmem:[%s1487_s7 + $0x158] sm:$0xff] }
  0x53   :  { %325 = vmatpush.msra.mxu0 %v1090_v24  ;;  %v603_v24 = vld [vmem:[%s1487_s7 + $0xf0] sm:$0xff] }
  0x54   :  { %362 = vmatpush.msra.mxu1 %v337_v41  ;;  %678 = vmatpush.msra.mxu3 %v603_v24  ;;  %v600_v41 = vld [vmem:[%s1487_s7 + $0xd8] sm:$0xff] }
  0x55   :  { %326 = vmatpush.msra.mxu0 %v221_v25  ;;  %v577_v25 = vld [vmem:[%s1487_s7 + $0x20] sm:$0xff] }
  0x56   :  { %363 = vmatpush.msra.mxu1 %v336_v42  ;;  %668 = vmatpush.msra.mxu2 %v577_v25 }
  0x57   :  { %327 = vmatpush.msra.mxu0 %v220_v26 }
  0x58   :  { %364 = vmatpush.msra.mxu1 %v335_v43  ;;  %669 = vmatpush.msra.mxu2 %v576_v31 }
  0x59   :  { %328 = vmatpush.msra.mxu0 %v219_v27  ;;  %v618_v27 = vld [vmem:[%s1487_s7 + $0x168] sm:$0xff] }
  0x5a   :  { %365 = vmatpush.msra.mxu1 %v334_v44  ;;  %670 = vmatpush.msra.mxu2 %v575_v39 }
  0x5b   :  { %329 = vmatpush.msra.mxu0 %v218_v28  ;;  %v602_v28 = vld [vmem:[%s1487_s7 + $0xe8] sm:$0xff] }
  0x5c   :  { %679 = vmatpush.msra.mxu3 %v602_v28  ;;  %671 = vmatpush.msra.mxu2 %v574_v45 }
  0x5e   :  { %680 = vmatpush.msra.mxu3 %v601_v32  ;;  %672 = vmatpush.msra.mxu2 %v573_v53  ;;  %v1300_v32 = vld [vmem:[%s1485_s5] sm:$0x1f] }
  0x5f   :  { %v605_v53 = vld [vmem:[%s1487_s7 + $0x100] sm:$0xff] }
  0x60   :  { %681 = vmatpush.msra.mxu3 %v600_v41  ;;  %v591_v41 = vld [vmem:[%s1487_s7 + $0x90] sm:$0xff] }
  0x62   :  { %682 = vmatpush.msra.mxu3 %v599_v48 }
  0x97   :  { %v1127_v49 = vpop.f32.mrf.mxu0  ;;  %v1129_v50 = vpop.f32.mrf.mxu1 }
  0x98   :  { %v397_v51 = vrot.slane %v1127_v49, 4  ;;  %v198_v52 = vmul.f32 %v1127_v49, %v1127_v49  ;;  %270 = vmatmul.f32.vlgmr.msrb.gmra.mxu1 %v1127_v49  ;;  %290 = vmatmul.f32.vlgmr.msrb.gmra.mxu2 %v1129_v50  ;;  %v199_v54 = vmul.f32 %v1129_v50, %v1129_v50 }
  0x9a   :  { %v398_v55 = vadd.f32 %v397_v51, %v1127_v49  ;;  %v431_v56 = vrot.slane %v198_v52, 4  ;;  %v200_v61 = vsub.f32 %v198_v52, %v199_v54 }
  0x9c   :  { %v399_v58 = vrot.slane %v398_v55, 2  ;;  %v432_v59 = vadd.f32 %v431_v56, %v198_v52 }
  0x9e   :  { %v400_v62 = vadd.f32 %v399_v58, %v398_v55  ;;  %v433_v63 = vrot.slane %v432_v59, 2  ;;  %v1148_v0 = vpop.f32.mrf.mxu2  ;;  %v614_v55 = vld [vmem:[%s1487_s7 + $0x148] sm:$0xff] }
  0x9f   :  { %v201_v2 = vmul.f32 %v1148_v0, %v1148_v0  ;;  %310 = vmatmul.f32.vlgmr.msrb.gmra.mxu3 %v1148_v0  ;;  %v1156_v3 = vpop.f32.mrf.mxu3 }
  0xa0   :  { %v434_v4 = vadd.f32 %v433_v63, %v432_v59  ;;  %v203_v5 = vmul.f32 %v1156_v3, %v1156_v3  ;;  %366 = vmatmul.f32.vlgmr.msra.gmra.mxu1 %v1127_v49  ;;  %v401_v7 = vrot.slane %v400_v62, 1  ;;  %v613_v59 = vld [vmem:[%s1487_s7 + $0x140] sm:$0xff] }
  0xa1   :  { %v202_v8 = vsub.f32 %v200_v61, %v201_v2  ;;  %v1164_v9 = vadd.f32 %v201_v2, %v199_v54 }
  0xa2   :  { %v435_v10 = vrot.slane %v434_v4, 1  ;;  %v402_v12 = vadd.f32 %v401_v7, %v400_v62  ;;  %v598_v62 = vld [vmem:[%s1487_s7 + $0xc8] sm:$0xff]  ;;  %v596_v7 = vld [vmem:[%s1487_s7 + $0xb8] sm:$0xff] }
  0xa3   :  { %830 = vrsqrt.f32 %v1164_v9  ;;  %v1170_v13 = vsub.f32 %v202_v8, %v203_v5  ;;  %683 = vmatpush.msra.mxu3 %v598_v62  ;;  %v597_v5 = vld [vmem:[%s1487_s7 + $0xc0] sm:$0xff]  ;;  %vm213_vm1 = vcmp.eq.f32.partialorder %v1164_v9, inf  ;;  %vm215_vm2 = vcmp.eq.f32.partialorder %v1164_v9, 0.0 }
  0xa4   :  { %v436_v15 = vadd.f32 %v435_v10, %v434_v4  ;;  %v1178_v17 = vmul.f32 0.25, %v402_v12  ;;  %v611_v10 = vld [vmem:[%s1487_s7 + $0x130] sm:$0xff] }
  0xa5   :  { %v415_v18 = vmul.f32 %v1170_v13, %v1170_v13  ;;  %250 = vmatmul.f32.vlgmr.msrb.gmra.mxu0 %v1170_v13  ;;  %v385_v20 = vrot.slane %v1170_v13, 4  ;;  %684 = vmatpush.msra.mxu3 %v597_v5 }
  0xa6   :  { %v456_v21 = vmul.f32 0.25, %v436_v15  ;;  %697 = vmatpush.msrb.mxu0 %v620_v14  ;;  %v461_v22 = vmul.f32 %v1178_v17, %v1178_v17  ;;  %v216_v14 = vand.u32 2147483648, %v1164_v9  ;;  %v595_v15 = vld [vmem:[%s1487_s7 + $0xb0] sm:$0xff]  ;;  %v476_v39 = vsub.f32 %v1127_v49, %v1178_v17 }
  0xa7   :  { %v419_v26 = vrot.slane %v415_v18, 4  ;;  %v386_v29 = vadd.f32 %v385_v20, %v1170_v13  ;;  %685 = vmatpush.msra.mxu3 %v596_v7 }
  0xa8   :  { %698 = vmatpush.msrb.mxu0 %v619_v19  ;;  %v466_v30 = vsub.f32 %v456_v21, %v461_v22  ;;  %v594_v22 = vld [vmem:[%s1487_s7 + $0xa8] sm:$0xff] }
  0xa9   :  { %v831_v33 = vpop.eup %830  ;;  %v420_v34 = vadd.f32 %v419_v26, %v415_v18  ;;  %v387_v36 = vrot.slane %v386_v29, 2  ;;  %v610_v18 = vld [vmem:[%s1487_s7 + $0x128] sm:$0xff]  ;;  %686 = vmatpush.msra.mxu3 %v595_v15 }
  0xaa   :  { %v207_v37 = vmul.f32 %v831_v33, %v1164_v9  ;;  %699 = vmatpush.msrb.mxu0 %v618_v27  ;;  %v471_v38 = vmax.f32 %v466_v30, 0.0  ;;  %v593_v27 = vld [vmem:[%s1487_s7 + $0xa0] sm:$0xff]  ;;  %v608_v30 = vld [vmem:[%s1487_s7 + $0x118] sm:$0xff] }
  0xab   :  { %v388_v42 = vadd.f32 %v387_v36, %v386_v29  ;;  %v421_v43 = vrot.slane %v420_v34, 2  ;;  %687 = vmatpush.msra.mxu3 %v594_v22  ;;  %v607_v36 = vld [vmem:[%s1487_s7 + $0x110] sm:$0xff] }
  0xac   :  { %700 = vmatpush.msrb.mxu0 %v617_v35  ;;  %v1224_v44 = vadd.f32 1e-05, %v471_v38  ;;  %v208_v46 = vmul.f32 %v831_v33, %v207_v37  ;;  %v1313_v38 = vld [vmem:[%s1486_s6] sm:$0x1f] }
  0xad   :  { %330 = vmatmul.f32.vlgmr.msra.gmra.mxu0 %v1156_v3  ;;  %v389_v51 = vrot.slane %v388_v42, 1  ;;  %v422_v52 = vadd.f32 %v421_v43, %v420_v34  ;;  %688 = vmatpush.msra.mxu3 %v593_v27  ;;  %v560_v17 = vperm.slane %v1313_v38, 2  ;;  %v558_v15 = vperm.slane %v1313_v38, 0 }
  0xae   :  { %701 = vmatpush.msrb.mxu0 %v616_v40  ;;  %832 = vrsqrt.f32 %v1224_v44  ;;  %v209_v54 = vmul.f32 0.5, %v208_v46  ;;  %vm510_vm4 = vweird.f32 %v1224_v44  ;;  %v543_v40 = vperm.slane %v1300_v32, 2 }
  0xaf   :  { %v390_v56 = vadd.f32 %v389_v51, %v388_v42  ;;  %v423_v57 = vrot.slane %v422_v52, 1 }
  0xb0   :  { %702 = vmatpush.msrb.mxu0 %v615_v47  ;;  %v210_v58 = vsub.f32 1.5, %v209_v54  ;;  %v590_v47 = vld [vmem:[%s1487_s7 + $0x88] sm:$0xff] }
  0xb1   :  { %v424_v60 = vadd.f32 %v423_v57, %v422_v52  ;;  %v1246_v61 = vmul.f32 0.25, %v390_v56  ;;  %v589_v56 = vld [vmem:[%s1487_s7 + $0x80] sm:$0xff] }
  0xb2   :  { %703 = vmatpush.msrb.mxu0 %v614_v55  ;;  %v211_v63 = vmul.f32 %v831_v33, %v210_v58  ;;  %v592_v33 = vld [vmem:[%s1487_s7 + $0x98] sm:$0xff] }
  0xb3   :  { %v454_v2 = vmul.f32 0.25, %v424_v60  ;;  %v459_v4 = vmul.f32 %v1246_v61, %v1246_v61  ;;  %689 = vmatpush.msra.mxu3 %v592_v33  ;;  %v636_v33 = vld [vmem:[%s1487_s7 + $0x1f8] sm:$0xff] }
  0xb4   :  { %v833_v6 = vpop.eup %832  ;;  %704 = vmatpush.msrb.mxu0 %v613_v59  ;;  %v212_v8 = vmul.f32 %v211_v63, %v1164_v9  ;;  %717 = vmatpush.msrb.mxu1 %v636_v33  ;;  %v643_v33 = vld [vmem:[%s1487_s7 + $0x230] sm:$0xff] }
  0xb5   :  { %v505_v11 = vmul.f32 %v833_v6, %v1224_v44  ;;  %v464_v12 = vsub.f32 %v454_v2, %v459_v4  ;;  %vm511_vm3 = vweird.f32 %v833_v6  ;;  %v606_v44 = vld [vmem:[%s1487_s7 + $0x108] sm:$0xff]  ;;  %690 = vmatpush.msra.mxu3 %v591_v41  ;;  %v629_v41 = vld [vmem:[%s1487_s7 + $0x1c0] sm:$0xff] }
  0xb6   :  { %705 = vmatpush.msrb.mxu0 %v612_v1  ;;  %v214_v16 = vsel %vm213_vm1, %v1164_v9, %v212_v8  ;;  %v609_v9 = vld [vmem:[%s1487_s7 + $0x120] sm:$0xff]  ;;  %vm512_vm5 = vmor %vm510_vm4, %vm511_vm3  ;;  %v474_v8 = vsub.f32 %v1170_v13, %v1246_v61 }
  0xb7   :  { %v506_v19 = vmul.f32 %v833_v6, %v505_v11  ;;  %v469_v20 = vmax.f32 %v464_v12, 0.0  ;;  %v1277_v21 = vsel %vm215_vm2, %v216_v14, %v214_v16  ;;  %691 = vmatpush.msra.mxu3 %v590_v47  ;;  %v627_v47 = vld [vmem:[%s1487_s7 + $0x1b0] sm:$0xff] }
  0xb8   :  { %706 = vmatpush.msrb.mxu0 %v611_v10  ;;  %v391_v23 = vrot.slane %v1277_v21, 4  ;;  %v416_v24 = vmul.f32 %v1277_v21, %v1277_v21  ;;  %v541_v10 = vperm.slane %v1300_v32, 0 }
  0xb9   :  { %v507_v25 = vmul.f32 0.5, %v506_v19  ;;  %v1288_v26 = vadd.f32 1e-05, %v469_v20  ;;  %692 = vmatpush.msra.mxu3 %v589_v56 }
  0xba   :  { %707 = vmatpush.msrb.mxu0 %v610_v18  ;;  %v392_v28 = vadd.f32 %v391_v23, %v1277_v21  ;;  %v425_v29 = vrot.slane %v416_v24, 4 }
  0xbb   :  { %v508_v31 = vsub.f32 1.5, %v507_v25  ;;  %834 = vrsqrt.f32 %v1288_v26  ;;  %vm490_vm7 = vweird.f32 %v1288_v26 }
  0xbc   :  { %708 = vmatpush.msrb.mxu0 %v609_v9  ;;  %v393_v34 = vrot.slane %v392_v28, 2  ;;  %v426_v35 = vadd.f32 %v425_v29, %v416_v24  ;;  %v559_v29 = vperm.slane %v1313_v38, 1 }
  0xbd   :  { %v509_v37 = vmul.f32 %v833_v6, %v508_v31 }
  0xbe   :  { %709 = vmatpush.msrb.mxu0 %v608_v30  ;;  %v394_v42 = vadd.f32 %v393_v34, %v392_v28  ;;  %v427_v43 = vrot.slane %v426_v35, 2  ;;  %v635_v34 = vld [vmem:[%s1487_s7 + $0x1f0] sm:$0xff] }
  0xbf   :  { %v513_v45 = vsel %vm512_vm5, %v833_v6, %v509_v37  ;;  %718 = vmatpush.msrb.mxu1 %v635_v34  ;;  %v632_v37 = vld [vmem:[%s1487_s7 + $0x1d8] sm:$0xff] }
  0xc0   :  { %710 = vmatpush.msrb.mxu0 %v607_v36  ;;  %v536_v46 = vmul.f32 %v513_v45, %v476_v39  ;;  %v395_v48 = vrot.slane %v394_v42, 1  ;;  %v428_v51 = vadd.f32 %v427_v43, %v426_v35  ;;  %v633_v35 = vld [vmem:[%s1487_s7 + $0x1e0] sm:$0xff]  ;;  %v631_v39 = vld [vmem:[%s1487_s7 + $0x1d0] sm:$0xff]  ;;  %v628_v45 = vld [vmem:[%s1487_s7 + $0x1b8] sm:$0xff] }
  0xc1   :  { %v835_v52 = vpop.eup %834 }
  0xc2   :  { %711 = vmatpush.msrb.mxu0 %v606_v44  ;;  %v553_v54 = vmul.f32 %v543_v40, %v536_v46  ;;  %v485_v55 = vmul.f32 %v835_v52, %v1288_v26  ;;  %v396_v57 = vadd.f32 %v395_v48, %v394_v42  ;;  %v429_v58 = vrot.slane %v428_v51, 1  ;;  %v630_v40 = vld [vmem:[%s1487_s7 + $0x1c8] sm:$0xff] }
  0xc3   :  { %vm491_vm6 = vweird.f32 %v835_v52  ;;  %v542_v26 = vperm.slane %v1300_v32, 1 }
  0xc4   :  { %712 = vmatpush.msrb.mxu0 %v605_v53  ;;  %v570_v59 = vadd.f32 %v560_v17, %v553_v54  ;;  %v486_v60 = vmul.f32 %v835_v52, %v485_v55  ;;  %v450_v62 = vmul.f32 0.25, %v396_v57  ;;  %v430_v63 = vadd.f32 %v429_v58, %v428_v51  ;;  %vm492_vm8 = vmor %vm490_vm7, %vm491_vm6  ;;  %v626_v54 = vld [vmem:[%s1487_s7 + $0x1a8] sm:$0xff]  ;;  %v652_v55 = vld [vmem:[%s1487_s7 + $0x278] sm:$0xff] }
  0xc5   :  { %737 = vmatpush.msrb.mxu2 %v652_v55 }
  0xc6   :  { %713 = vmatmul.f32.vlgmr.msrb.gmra.mxu0 %v570_v59  ;;  %v487_v1 = vmul.f32 0.5, %v486_v60  ;;  %v460_v2 = vmul.f32 %v450_v62, %v450_v62  ;;  %v455_v4 = vmul.f32 0.25, %v430_v63  ;;  %v475_v25 = vsub.f32 %v1277_v21, %v450_v62  ;;  %v634_v21 = vld [vmem:[%s1487_s7 + $0x1e8] sm:$0xff]  ;;  %v625_v59 = vld [vmem:[%s1487_s7 + $0x1a0] sm:$0xff]  ;;  %v651_v60 = vld [vmem:[%s1487_s7 + $0x270] sm:$0xff] }
  0xc7   :  { %719 = vmatpush.msrb.mxu1 %v634_v21  ;;  %738 = vmatpush.msrb.mxu2 %v651_v60 }
  0xc8   :  { %v488_v5 = vsub.f32 1.5, %v487_v1  ;;  %v465_v6 = vsub.f32 %v455_v4, %v460_v2  ;;  %v624_v2 = vld [vmem:[%s1487_s7 + $0x198] sm:$0xff]  ;;  %v650_v4 = vld [vmem:[%s1487_s7 + $0x268] sm:$0xff] }
  0xc9   :  { %720 = vmatpush.msrb.mxu1 %v633_v35  ;;  %739 = vmatpush.msrb.mxu2 %v650_v4 }
  0xca   :  { %v489_v7 = vmul.f32 %v835_v52, %v488_v5  ;;  %v470_v11 = vmax.f32 %v465_v6, 0.0 }
  0xcb   :  { %721 = vmatpush.msrb.mxu1 %v632_v37  ;;  %v642_v37 = vld [vmem:[%s1487_s7 + $0x228] sm:$0xff] }
  0xcc   :  { %v493_v12 = vsel %vm492_vm8, %v835_v52, %v489_v7  ;;  %v480_v16 = vadd.f32 1e-05, %v470_v11 }
  0xcd   :  { %v534_v14 = vmul.f32 %v493_v12, %v474_v8  ;;  %722 = vmatpush.msrb.mxu1 %v631_v39  ;;  %v623_v8 = vld [vmem:[%s1487_s7 + $0x190] sm:$0xff]  ;;  %v827_v12 = vld [vmem:[%s1484_s4] ss:$0 sm:$0xff] }
  0xce   :  { %836 = vrsqrt.f32 %v480_v16  ;;  %vm500_vm10 = vweird.f32 %v480_v16 }
  0xcf   :  { %v551_v18 = vmul.f32 %v541_v10, %v534_v14  ;;  %723 = vmatpush.msrb.mxu1 %v630_v40  ;;  %v649_v10 = vld [vmem:[%s1487_s7 + $0x260] sm:$0xff] }
  0xd0   :  { %740 = vmatpush.msrb.mxu2 %v649_v10 }
  0xd1   :  { %v568_v19 = vadd.f32 %v558_v15, %v551_v18  ;;  %724 = vmatpush.msrb.mxu1 %v629_v41  ;;  %v621_v18 = vld [vmem:[%s1487_s7 + $0x180] sm:$0xff] }
  0xd2   :  { %v641_v41 = vld [vmem:[%s1487_s7 + $0x220] sm:$0xff] }
  0xd3   :  { %673 = vmatmul.f32.vlgmr.msra.gmra.mxu2 %v568_v19  ;;  %725 = vmatpush.msrb.mxu1 %v628_v45  ;;  %v647_v19 = vld [vmem:[%s1487_s7 + $0x250] sm:$0xff] }
  0xd4   :  { %v837_v20 = vpop.eup %836 }
  0xd5   :  { %v495_v22 = vmul.f32 %v837_v20, %v480_v16  ;;  %vm501_vm9 = vweird.f32 %v837_v20  ;;  %726 = vmatpush.msrb.mxu1 %v627_v47 }
  0xd6   :  { %vm502_vm11 = vmor %vm500_vm10, %vm501_vm9 }
  0xd7   :  { %v496_v23 = vmul.f32 %v837_v20, %v495_v22  ;;  %727 = vmatpush.msrb.mxu1 %v626_v54 }
  0xd9   :  { %v497_v24 = vmul.f32 0.5, %v496_v23  ;;  %728 = vmatpush.msrb.mxu1 %v625_v59 }
  0xdb   :  { %v498_v9 = vsub.f32 1.5, %v497_v24  ;;  %729 = vmatpush.msrb.mxu1 %v624_v2 }
  0xdd   :  { %v499_v61 = vmul.f32 %v837_v20, %v498_v9  ;;  %730 = vmatpush.msrb.mxu1 %v623_v8  ;;  %v646_v9 = vld [vmem:[%s1487_s7 + $0x248] sm:$0xff]  ;;  %v561_v8 = vperm.slane %v1313_v38, 3 }
  0xdf   :  { %v503_v27 = vsel %vm502_vm11, %v837_v20, %v499_v61  ;;  %v374_v61 = vmul.f32 %v827_v12, %v1170_v13 }
  0xe0   :  { %v535_v28 = vmul.f32 %v503_v27, %v475_v25 }
  0xe2   :  { %v552_v30 = vmul.f32 %v542_v26, %v535_v28 }
  0xe4   :  { %v569_v31 = vadd.f32 %v559_v29, %v552_v30  ;;  %v644_v30 = vld [vmem:[%s1487_s7 + $0x238] sm:$0xff] }
  0xe6   :  { %693 = vmatmul.f32.vlgmr.msra.gmra.mxu3 %v569_v31 }
 0x115   :  { %v271_v36 = vpop.f32.mrf.mxu1 }
 0x116   :  { %v376_v5 = vmul.f32 %v271_v36, %v1127_v49  ;;  %v622_v49 = vld [vmem:[%s1487_s7 + $0x188] sm:$0xff] }
 0x117   :  { %731 = vmatpush.msrb.mxu1 %v622_v49 }
 0x119   :  { %732 = vmatpush.msrb.mxu1 %v621_v18 }
 0x11b   :  { %v291_v48 = vpop.f32.mrf.mxu2 }
 0x11c   :  { %v377_v62 = vmul.f32 %v291_v48, %v1129_v50 }
 0x11d   :  { %v1368_v42 = vpop.f32.mrf.mxu1 }
 0x11e   :  { %v403_v43 = vrot.slane %v1368_v42, 4  ;;  %v417_v44 = vmul.f32 %v1368_v42, %v1368_v42  ;;  %v378_v11 = vsub.f32 %v376_v5, %v377_v62  ;;  %v544_v5 = vperm.slane %v1300_v32, 3 }
 0x120   :  { %v404_v46 = vadd.f32 %v403_v43, %v1368_v42  ;;  %v437_v17 = vrot.slane %v417_v44, 4  ;;  %v640_v43 = vld [vmem:[%s1487_s7 + $0x218] sm:$0xff] }
 0x122   :  { %v405_v51 = vrot.slane %v404_v46, 2  ;;  %v438_v52 = vadd.f32 %v437_v17, %v417_v44  ;;  %v251_v53 = vpop.f32.mrf.mxu0  ;;  %v311_v58 = vpop.f32.mrf.mxu3  ;;  %v639_v17 = vld [vmem:[%s1487_s7 + $0x210] sm:$0xff] }
 0x123   :  { %v379_v6 = vmul.f32 %v311_v58, %v1148_v0  ;;  %v648_v0 = vld [vmem:[%s1487_s7 + $0x258] sm:$0xff]  ;;  %v375_v27 = vadd.f32 %v374_v61, %v251_v53 }
 0x124   :  { %v406_v56 = vadd.f32 %v405_v51, %v404_v46  ;;  %v439_v57 = vrot.slane %v438_v52, 2  ;;  %741 = vmatpush.msrb.mxu2 %v648_v0  ;;  %v773_v61 = vld [vmem:[#allocation7 + $0x78] sm:$0xff] }
 0x125   :  { %v380_v20 = vsub.f32 %v378_v11, %v379_v6  ;;  %778 = vmatpush.msrb.mxu3 %v773_v61 }
 0x126   :  { %v407_v63 = vrot.slane %v406_v56, 1  ;;  %v440_v1 = vadd.f32 %v439_v57, %v438_v52  ;;  %742 = vmatpush.msrb.mxu2 %v647_v19  ;;  %v638_v52 = vld [vmem:[%s1487_s7 + $0x208] sm:$0xff]  ;;  %v545_v19 = vperm.slane %v1300_v32, 4  ;;  %v766_v32 = vld [vmem:[#allocation7 + $0x40] sm:$0xff] }
 0x128   :  { %v408_v7 = vadd.f32 %v407_v63, %v406_v56  ;;  %v441_v50 = vrot.slane %v440_v1, 1  ;;  %743 = vmatpush.msrb.mxu2 %v646_v9  ;;  %v637_v56 = vld [vmem:[%s1487_s7 + $0x200] sm:$0xff] }
 0x12a   :  { %v442_v14 = vadd.f32 %v441_v50, %v440_v1  ;;  %v1416_v15 = vmul.f32 0.25, %v408_v7  ;;  %v331_v16 = vpop.f32.mrf.mxu0 }
 0x12b   :  { %v381_v22 = vmul.f32 %v331_v16, %v1156_v3  ;;  %v645_v3 = vld [vmem:[%s1487_s7 + $0x240] sm:$0xff] }
 0x12c   :  { %v457_v23 = vmul.f32 0.25, %v442_v14  ;;  %v462_v24 = vmul.f32 %v1416_v15, %v1416_v15  ;;  %744 = vmatpush.msrb.mxu2 %v645_v3  ;;  %v477_v4 = vsub.f32 %v1368_v42, %v1416_v15  ;;  %v770_v3 = vld [vmem:[#allocation7 + $0x60] sm:$0xff] }
 0x12d   :  { %v382_v25 = vsub.f32 %v380_v20, %v381_v22 }
 0x12e   :  { %v467_v26 = vsub.f32 %v457_v23, %v462_v24  ;;  %745 = vmatpush.msrb.mxu2 %v644_v30  ;;  %v562_v23 = vperm.slane %v1313_v38, 4  ;;  %v765_v30 = vld [vmem:[#allocation7 + $0x38] sm:$0xff]  ;;  %v764_v38 = vld [vmem:[#allocation7 + $0x30] sm:$0xff] }
 0x12f   :  { %v383_v28 = vmul.f32 2.0, %v382_v25  ;;  %v772_v25 = vld [vmem:[#allocation7 + $0x70] sm:$0xff] }
 0x130   :  { %v472_v29 = vmax.f32 %v467_v26, 0.0  ;;  %746 = vmatpush.msrb.mxu2 %v643_v33  ;;  %v771_v26 = vld [vmem:[#allocation7 + $0x68] sm:$0xff]  ;;  %779 = vmatpush.msrb.mxu3 %v772_v25  ;;  %v761_v33 = vld [vmem:[#allocation7 + $0x18] sm:$0xff] }
 0x131   :  { %v1437_v31 = vsub.f32 %v375_v27, %v383_v28  ;;  %v769_v27 = vld [vmem:[#allocation7 + $0x58] sm:$0xff]  ;;  %v768_v28 = vld [vmem:[#allocation7 + $0x50] sm:$0xff] }
 0x132   :  { %v482_v13 = vadd.f32 1e-05, %v472_v29  ;;  %747 = vmatpush.msrb.mxu2 %v642_v37  ;;  %780 = vmatpush.msrb.mxu3 %v771_v26  ;;  %v767_v29 = vld [vmem:[#allocation7 + $0x48] sm:$0xff] }
 0x133   :  { %v409_v34 = vrot.slane %v1437_v31, 4  ;;  %v418_v21 = vmul.f32 %v1437_v31, %v1437_v31 }
 0x134   :  { %838 = vrsqrt.f32 %v482_v13  ;;  %748 = vmatpush.msrb.mxu2 %v641_v41  ;;  %vm520_vm13 = vweird.f32 %v482_v13  ;;  %781 = vmatpush.msrb.mxu3 %v770_v3 }
 0x135   :  { %v410_v35 = vadd.f32 %v409_v34, %v1437_v31  ;;  %v443_v36 = vrot.slane %v418_v21, 4  ;;  %v760_v34 = vld [vmem:[#allocation7 + $0x10] sm:$0xff] }
 0x136   :  { %749 = vmatpush.msrb.mxu2 %v640_v43  ;;  %782 = vmatpush.msrb.mxu3 %v769_v27 }
 0x137   :  { %v411_v39 = vrot.slane %v410_v35, 2  ;;  %v444_v40 = vadd.f32 %v443_v36, %v418_v21  ;;  %v759_v21 = vld [vmem:[#allocation7 + $0x8] sm:$0xff]  ;;  %v828_v36 = vld [vmem:[%s1488_s8] ss:$0 sm:$0xff] }
 0x138   :  { %750 = vmatpush.msrb.mxu2 %v639_v17  ;;  %783 = vmatpush.msrb.mxu3 %v768_v28 }
 0x139   :  { %v412_v44 = vadd.f32 %v411_v39, %v410_v35  ;;  %v445_v45 = vrot.slane %v444_v40, 2  ;;  %v758_v35 = vld [vmem:[#allocation7] sm:$0xff] }
 0x13a   :  { %v839_v46 = vpop.eup %838  ;;  %751 = vmatpush.msrb.mxu2 %v638_v52  ;;  %784 = vmatpush.msrb.mxu3 %v767_v29 }
 0x13b   :  { %v515_v47 = vmul.f32 %v839_v46, %v482_v13  ;;  %v413_v48 = vrot.slane %v412_v44, 1  ;;  %v446_v51 = vadd.f32 %v445_v45, %v444_v40  ;;  %vm521_vm12 = vweird.f32 %v839_v46  ;;  %v762_v13 = vld [vmem:[#allocation7 + $0x20] sm:$0xff] }
 0x13c   :  { %752 = vmatpush.msrb.mxu2 %v637_v56  ;;  %vm522_vm14 = vmor %vm520_vm13, %vm521_vm12  ;;  %785 = vmatpush.msrb.mxu3 %v766_v32 }
 0x13d   :  { %v516_v53 = vmul.f32 %v839_v46, %v515_v47  ;;  %v414_v54 = vadd.f32 %v413_v48, %v412_v44  ;;  %v447_v55 = vrot.slane %v446_v51, 1 }
 0x13e   :  { %786 = vmatpush.msrb.mxu3 %v765_v30 }
 0x13f   :  { %v517_v57 = vmul.f32 0.5, %v516_v53  ;;  %v448_v58 = vadd.f32 %v447_v55, %v446_v51  ;;  %v453_v59 = vmul.f32 0.25, %v414_v54  ;;  %v829_v51 = vld [vmem:[%s1490_s10] ss:$0 sm:$0xff] }
 0x140   :  { %787 = vmatpush.msrb.mxu3 %v764_v38 }
 0x141   :  { %v518_v60 = vsub.f32 1.5, %v517_v57  ;;  %v458_v62 = vmul.f32 0.25, %v448_v58  ;;  %v463_v63 = vmul.f32 %v453_v59, %v453_v59  ;;  %v478_v15 = vsub.f32 %v1437_v31, %v453_v59  ;;  %v763_v31 = vld [vmem:[#allocation7 + $0x28] sm:$0xff] }
 0x142   :  { %788 = vmatpush.msrb.mxu3 %v763_v31 }
 0x143   :  { %v519_v1 = vmul.f32 %v839_v46, %v518_v60  ;;  %v468_v2 = vsub.f32 %v458_v62, %v463_v63  ;;  %v714_v43 = vpop.f32.mrf.mxu0 }
 0x144   :  { %789 = vmatpush.msrb.mxu3 %v762_v13 }
 0x145   :  { %v523_v6 = vsel %vm522_vm14, %v839_v46, %v519_v1  ;;  %v473_v7 = vmax.f32 %v468_v2, 0.0 }
 0x146   :  { %v537_v50 = vmul.f32 %v523_v6, %v477_v4  ;;  %790 = vmatpush.msrb.mxu3 %v761_v33 }
 0x147   :  { %v483_v10 = vadd.f32 1e-05, %v473_v7 }
 0x148   :  { %v554_v11 = vmul.f32 %v544_v5, %v537_v50  ;;  %791 = vmatpush.msrb.mxu3 %v760_v34 }
 0x149   :  { %840 = vrsqrt.f32 %v483_v10  ;;  %vm530_vm0 = vweird.f32 %v483_v10 }
 0x14a   :  { %v571_v12 = vadd.f32 %v561_v8, %v554_v11  ;;  %792 = vmatpush.msrb.mxu3 %v759_v21 }
 0x14c   :  { %733 = vmatmul.f32.vlgmr.msrb.gmra.mxu1 %v571_v12  ;;  %793 = vmatpush.msrb.mxu3 %v758_v35 }
 0x14f   :  { %v841_v49 = vpop.eup %840 }
 0x150   :  { %v525_v0 = vmul.f32 %v841_v49, %v483_v10  ;;  %vm531_vm15 = vweird.f32 %v841_v49 }
 0x151   :  { %vm532_vm1 = vmor %vm530_vm0, %vm531_vm15 }
 0x152   :  { %v526_v14 = vmul.f32 %v841_v49, %v525_v0 }
 0x154   :  { %v527_v16 = vmul.f32 0.5, %v526_v14 }
 0x156   :  { %v528_v18 = vsub.f32 1.5, %v527_v16  ;;  %v674_v37 = vpop.f32.mrf.mxu2 }
 0x157   :  { %v675_v40 = vadd.f32 %v828_v36, %v674_v37 }
 0x158   :  { %v529_v42 = vmul.f32 %v841_v49, %v528_v18 }
 0x15a   :  { %v533_v20 = vsel %vm532_vm1, %v841_v49, %v529_v42 }
 0x15b   :  { %v538_v22 = vmul.f32 %v533_v20, %v478_v15 }
 0x15d   :  { %v555_v24 = vmul.f32 %v545_v19, %v538_v22 }
 0x15f   :  { %v572_v9 = vadd.f32 %v562_v23, %v555_v24 }
 0x161   :  { %753 = vmatmul.f32.vlgmr.msrb.gmra.mxu2 %v572_v9 }
 0x169   :  { %v694_v39 = vpop.f32.mrf.mxu3 }
 0x16a   :  { %v695_v41 = vadd.f32 %v694_v39, %v675_v40 }
 0x16c   :  { %v715_v45 = vadd.f32 %v714_v43, %v695_v41 }
 0x1c9   :  { %v734_v44 = vpop.f32.mrf.mxu1 }
 0x1ca   :  { %v735_v46 = vadd.f32 %v734_v44, %v715_v45 }
 0x1e4   :  { %v754_v17 = vpop.f32.mrf.mxu2 }
 0x1e5   :  { %v755_v47 = vadd.f32 %v754_v17, %v735_v46 }
 0x1e7   :  { %v757_v48 = vmax.f32 %v755_v47, 0.0 }
 0x1e9   :  { %794 = vmatmul.f32.vlgmr.msrb.gmra.mxu3 %v757_v48 }
 0x26c   :  { %v795_v52 = vpop.f32.mrf.mxu3 }
 0x26d   :  { %v796_v53 = vadd.f32 %v829_v51, %v795_v52 }
 0x26f   :  { %v798_v54 = vand.u32 2147483647, %v796_v53  ;;  %vm804_vm2 = vcmp.ge.f32.partialorder %v796_v53, 0.0 }
 0x271   :  { %v799_v55 = vsub.f32 0.0, %v798_v54 }
 0x273   :  { %v800_v56 = vmul.f32 1.442695, %v799_v55 }
 0x275   :  { %842 = vpow2.f32 %v800_v56 }
 0x27b   :  { %v843_v57 = vpop.eup %842 }
 0x27c   :  { %v802_v58 = vadd.f32 1.0, %v843_v57 }
 0x27e   :  { %844 = vrcp.f32 %v802_v58 }
 0x284   :  { %v845_v59 = vpop.eup %844 }
 0x285   :  { %v805_v60 = vsub.f32 1.0, %v845_v59 }
 0x287   :  { %v806_v62 = vsel %vm804_vm2, %v845_v59, %v805_v60 }
 0x288   :  { %807 = vst [vmem:[%s1491_s11] sm:$0xff] %v806_v62 }
 0x289   :  { %812 = vsyncpa [#allocation3], 1 }
 0x28a   :  { %813 = vsyncpa [#allocation5], 1 }
 0x28b   :  { %814 = vsyncpa [#allocation8], 1 }

</bundles_post_ra>
